<compile_context>
chip_gen: v7x
topology: tpu7x:2x2x1
jax: 0.10.0
libtpu: 0.0.40
codegen_flags: <defaults>
</compile_context>

<pallas_src>
import math
import functools

import jax
import jax.numpy as jnp
from jax import lax
from jax.experimental import pallas as pl
from jax.experimental.pallas import tpu as pltpu


def _layernorm(x, gain, bias, eps):
    # x: (T, E) f32, gain/bias: (1, E) f32.  Matches the custom PyTorch module
    # (unbiased std, eps added to std, not to variance).  Exact divide.
    n = x.shape[-1]
    mean = jnp.mean(x, axis=-1, keepdims=True)
    var = jnp.sum((x - mean) ** 2, axis=-1, keepdims=True) * (1.0 / (n - 1))
    std = jnp.sqrt(var)
    return gain * (x - mean) / (std + eps) + bias


def encoder_layer_kernel(
    x_ref,                          # (1, S, E)  input activations (full sequence, one batch)
    wq_ref, wk_ref, wv_ref,         # (E, E) each, (in, out) layout, mxu_dtype
    wo_ref, bo_ref,                 # (E, E) (in, out) mxu_dtype, (1, E) f32
    g1_ref, be1_ref,                # layernorm1 gain/bias (1, E) f32
    w1_ref, bf1_ref,                # fc1 (E, H) (in, out) mxu_dtype, (1, H) f32
    w2_ref, bf2_ref,                # fc2 (H, E) (in, out) mxu_dtype, (1, E) f32
    g2_ref, be2_ref,                # layernorm2 gain/bias (1, E) f32
    o_ref,                          # (1, tS, E)
    k_scr, v_scr,                   # (S, E) mxu_dtype scratch -- persists across seq tiles
    ctx_scr,                        # (tS, E) f32 scratch -- per-head context slab
    *, num_heads, eps, mxu_dtype,
):
    S, E = x_ref.shape[1], x_ref.shape[2]
    tS = o_ref.shape[1]
    dh = E // num_heads
    scale = 1.0 / math.sqrt(dh)
    j = pl.program_id(1)

    # ---- K / V projections: once per batch element (j == 0), reused for all seq tiles ----
    @pl.when(j == 0)
    def _():
        xkv = x_ref[0].astype(mxu_dtype)                                  # (S, E) MXU operand
        k_scr[...] = jnp.dot(xkv, wk_ref[...],
                             preferred_element_type=jnp.float32).astype(mxu_dtype)
        v_scr[...] = jnp.dot(xkv, wv_ref[...],
                             preferred_element_type=jnp.float32).astype(mxu_dtype)

    # Query/output rows handled by this grid step.
    q_start = pl.multiple_of(j * tS, tS)
    x_q = x_ref[0, pl.ds(q_start, tS), :].astype(jnp.float32)             # (tS, E) residual

    # Q projection; 1/sqrt(dh) folded into q once (not per-head on the (tS,S) scores).
    q = jnp.dot(x_q.astype(mxu_dtype), wq_ref[...],
                preferred_element_type=jnp.float32) * scale               # (tS, E) f32
    q_c = q.astype(mxu_dtype)

    k_b = k_scr[...]                                                      # (S, E) mxu_dtype
    v_b = v_scr[...]

    # ---- per-head attention; contexts packed into ctx_scr, Wo applied once afterwards ----
    dn_qk = (((1,), (1,)), ((), ()))   # contract last dims of q_h and k_h (no transpose)
    for h in range(num_heads):
        lo = h * dh
        s = lax.dot_general(q_c[:, lo:lo + dh], k_b[:, lo:lo + dh], dn_qk,
                            preferred_element_type=jnp.float32)           # (tS, S)
        m = jnp.max(s, axis=-1, keepdims=True)
        p = jnp.exp(s - m)
        attn = p * pl.reciprocal(jnp.sum(p, axis=-1, keepdims=True), approx=True)
        ctx_scr[:, lo:lo + dh] = jnp.dot(attn.astype(mxu_dtype), v_b[:, lo:lo + dh],
                                         preferred_element_type=jnp.float32)

    # Single full-width (K = E) output projection -- fills the MXU, no per-head drains.
    attn_out = jnp.dot(ctx_scr[...].astype(mxu_dtype), wo_ref[...],
                       preferred_element_type=jnp.float32) + bo_ref[...]  # (tS, E)

    # TODO(synk): dropout is a no-op (inference mode).

    # ---- residual + layernorm 1 ----
    x1 = _layernorm(x_q + attn_out, g1_ref[...], be1_ref[...], eps)       # (tS, E)

    # ---- position-wise feed forward ----
    h1 = jnp.dot(x1.astype(mxu_dtype), w1_ref[...],
                 preferred_element_type=jnp.float32) + bf1_ref[...]       # (tS, H)
    h1 = jnp.maximum(h1, 0.0)
    ff = jnp.dot(h1.astype(mxu_dtype), w2_ref[...],
                 preferred_element_type=jnp.float32) + bf2_ref[...]       # (tS, E)

    # ---- residual + layernorm 2 ----
    out = _layernorm(x1 + ff, g2_ref[...], be2_ref[...], eps)             # (tS, E)

    o_ref[0] = out.astype(o_ref.dtype)


def prepare_params(params, mxu_dtype=jnp.bfloat16):
    """One-time host-side prep (hoisted out of the per-call path):
    transpose PyTorch (out, in) weights to (in, out) and cast MXU operands."""
    mxu_dtype = jnp.dtype(mxu_dtype)
    f32 = jnp.float32
    return {
        "wq": jnp.asarray(params["wq"]).T.astype(mxu_dtype),   # (E, E)
        "wk": jnp.asarray(params["wk"]).T.astype(mxu_dtype),
        "wv": jnp.asarray(params["wv"]).T.astype(mxu_dtype),
        "wo": jnp.asarray(params["wo"]).T.astype(mxu_dtype),
        "w1": jnp.asarray(params["w1"]).T.astype(mxu_dtype),   # (E, H)
        "w2": jnp.asarray(params["w2"]).T.astype(mxu_dtype),   # (H, E)
        "bo": jnp.asarray(params["bo"], f32),
        "bf1": jnp.asarray(params["bf1"], f32),
        "bf2": jnp.asarray(params["bf2"], f32),
        "g1": jnp.asarray(params["g1"], f32),
        "be1": jnp.asarray(params["be1"], f32),
        "g2": jnp.asarray(params["g2"], f32),
        "be2": jnp.asarray(params["be2"], f32),
    }


def encoder_layer(x, prep, *, num_heads, eps=1e-6, seq_tile=None):
    """Pallas TPU EncoderLayer forward.  `prep` comes from prepare_params()."""
    B, S, E = x.shape
    H = prep["w1"].shape[1]
    mxu_dtype = jnp.dtype(prep["wq"].dtype)

    # Sequence tile: second-to-last block dim must be a multiple of 8 or the full S.
    # 256 is the v6e sweet spot; use 128 on v5e; re-check the 64 MiB budget on v7x.
    if seq_tile is None:
        if S <= 128:
            seq_tile = S
        elif S % 256 == 0:
            seq_tile = 256
        elif S % 128 == 0:
            seq_tile = 128
        else:
            seq_tile = S
    assert S % seq_tile == 0 and (seq_tile == S or seq_tile % 8 == 0)

    kernel = functools.partial(encoder_layer_kernel, num_heads=num_heads,
                               eps=eps, mxu_dtype=mxu_dtype)

    grid = (B, S // seq_tile)

    # ---- VMEM budget (explicit limit, sized from the actual buffers, with headroom) ----
    w_item = mxu_dtype.itemsize
    x_item = x.dtype.itemsize
    weight_bytes = (4 * E * E + 2 * E * H) * w_item
    est = (
        2 * S * E * x_item                 # x block (double-buffered)
        + weight_bytes                     # weights (single-buffered)
        + 2 * S * E * w_item               # K / V scratch
        + seq_tile * E * 4                 # ctx scratch
        + 2 * seq_tile * E * x_item        # out block (double-buffered)
        + seq_tile * S * 4                 # score tile
        + seq_tile * H * 4                 # h1
        + 4 * seq_tile * E * 4             # q / x1 / ff / misc f32 intermediates
    )
    vmem_limit_bytes = int(min(max(2 * est, 32 * 1024 * 1024), 128 * 1024 * 1024))

    # Advisory cost estimate (accurate now that K/V are computed once per batch element).
    matmul_flops = 2 * S * E * E * 4 + 4 * S * S * E + 4 * S * E * H
    cost = pl.CostEstimate(flops=int(B * matmul_flops),
                           transcendentals=int(B * num_heads * S * S),
                           bytes_accessed=int(2 * x.size * x_item + weight_bytes))

    def build_and_call(single_buffer_consts):
        def const_spec(shape):
            # Constant index_map -> the second pipeline buffer is pure waste; request 1.
            if single_buffer_consts:
                return pl.BlockSpec(shape, lambda b, j: (0,) * len(shape),
                                    pipeline_mode=pl.Buffered(1))
            return pl.BlockSpec(shape, lambda b, j: (0,) * len(shape))

        in_specs = [
            pl.BlockSpec((1, S, E), lambda b, j: (b, 0, 0)),              # x (full sequence)
            const_spec((E, E)), const_spec((E, E)), const_spec((E, E)),   # wq wk wv
            const_spec((E, E)), const_spec((1, E)),                       # wo bo
            const_spec((1, E)), const_spec((1, E)),                       # ln1 gain/bias
            const_spec((E, H)), const_spec((1, H)),                       # fc1
            const_spec((H, E)), const_spec((1, E)),                       # fc2
            const_spec((1, E)), const_spec((1, E)),                       # ln2 gain/bias
        ]
        out_specs = pl.BlockSpec((1, seq_tile, E), lambda b, j: (b, j, 0))

        return pl.pallas_call(
            kernel,
            out_shape=jax.ShapeDtypeStruct((B, S, E), x.dtype),
            grid_spec=pltpu.PrefetchScalarGridSpec(
                num_scalar_prefetch=0,
                grid=grid,
                in_specs=in_specs,
                out_specs=out_specs,
                scratch_shapes=[
                    pltpu.VMEM((S, E), mxu_dtype),            # K (per batch element)
                    pltpu.VMEM((S, E), mxu_dtype),            # V (per batch element)
                    pltpu.VMEM((seq_tile, E), jnp.float32),   # per-head context slab
                ],
            ),
            compiler_params=pltpu.CompilerParams(
                # batch axis parallel (megacore), seq-tile axis arbitrary (K/V scratch reuse)
                dimension_semantics=("parallel", "arbitrary"),
                vmem_limit_bytes=vmem_limit_bytes,
            ),
            cost_estimate=cost,
        )(
            x,
            prep["wq"], prep["wk"], prep["wv"],
            prep["wo"], prep["bo"],
            prep["g1"], prep["be1"],
            prep["w1"], prep["bf1"],
            prep["w2"], prep["bf2"],
            prep["g2"], prep["be2"],
        )

    try:
        return build_and_call(True)
    except Exception:
        # Fallback for jax versions where BlockSpec pipeline_mode=pl.Buffered(1) is not
        # accepted by pallas_call; identical kernel, default double-buffered constants.
        return build_and_call(False)

    # TODO(synk): for v7x with very large H (H=4E), stream w1/w2 in H-chunks (extra grid
    # axis or manual DMA from pl.ANY) to bound FFN weight residency under the 64 MiB VMEM.


def encoder_layer_ref(x, params, *, num_heads, eps=1e-6):
    """Pure-JAX f32 reference mirroring the PyTorch forward (eval mode)."""
    B, S, E = x.shape
    head_dim = E // num_heads

    def linear(inp, w, b=None):
        y = jnp.einsum("bsi,oi->bso", inp, w)
        return y if b is None else y + b

    q = linear(x, params["wq"]).reshape(B, S, num_heads, head_dim).transpose(0, 2, 1, 3)
    k = linear(x, params["wk"]).reshape(B, S, num_heads, head_dim).transpose(0, 2, 1, 3)
    v = linear(x, params["wv"]).reshape(B, S, num_heads, head_dim).transpose(0, 2, 1, 3)
    scores = jnp.einsum("bhqd,bhkd->bhqk", q, k) / math.sqrt(head_dim)
    attn = jax.nn.softmax(scores, axis=-1)
    out = jnp.einsum("bhqk,bhkd->bhqd", attn, v).transpose(0, 2, 1, 3).reshape(B, S, E)
    attn_out = linear(out, params["wo"], params["bo"][0])

    def ln(z, gain, bias):
        mean = jnp.mean(z, axis=-1, keepdims=True)
        std = jnp.sqrt(jnp.sum((z - mean) ** 2, axis=-1, keepdims=True) / (E - 1))
        return gain[0] * (z - mean) / (std + eps) + bias[0]

    x1 = ln(x + attn_out, params["g1"], params["be1"])
    h1 = jnp.maximum(linear(x1, params["w1"], params["bf1"][0]), 0.0)
    ff = linear(h1, params["w2"], params["bf2"][0])
    return ln(x1 + ff, params["g2"], params["be2"])


if __name__ == "__main__":
    B, S, E = 2, 8, 32
    num_heads = 4
    hidden_dim = 64

    key = jax.random.PRNGKey(0)
    keys = jax.random.split(key, 10)
    scale = 0.1
    params = {
        "wq": scale * jax.random.normal(keys[0], (E, E), jnp.float32),
        "wk": scale * jax.random.normal(keys[1], (E, E), jnp.float32),
        "wv": scale * jax.random.normal(keys[2], (E, E), jnp.float32),
        "wo": scale * jax.random.normal(keys[3], (E, E), jnp.float32),
        "bo": scale * jax.random.normal(keys[4], (1, E), jnp.float32),
        "g1": jnp.ones((1, E), jnp.float32),
        "be1": jnp.zeros((1, E), jnp.float32),
        "w1": scale * jax.random.normal(keys[5], (hidden_dim, E), jnp.float32),
        "bf1": scale * jax.random.normal(keys[6], (1, hidden_dim), jnp.float32),
        "w2": scale * jax.random.normal(keys[7], (E, hidden_dim), jnp.float32),
        "bf2": scale * jax.random.normal(keys[8], (1, E), jnp.float32),
        "g2": jnp.ones((1, E), jnp.float32),
        "be2": jnp.zeros((1, E), jnp.float32),
    }

    x = jax.random.normal(keys[9], (B, S, E), jnp.float32)

    ref = encoder_layer_ref(x, params, num_heads=num_heads)

    # f32 MXU operands: only drift source is the approx (EUP) reciprocal in the softmax.
    prep_f32 = prepare_params(params, mxu_dtype=jnp.float32)
    out_f32 = jax.block_until_ready(encoder_layer(x, prep_f32, num_heads=num_heads))
    assert out_f32.shape == (B, S, E)
    assert jnp.allclose(out_f32, ref, rtol=2e-2, atol=2e-2), "f32 kernel mismatch vs reference"

    # Recommended TPU config: bf16 MXU operands / bf16 weights in HBM, f32 accumulation.
    prep_bf16 = prepare_params(params, mxu_dtype=jnp.bfloat16)
    out_bf16 = jax.block_until_ready(encoder_layer(x, prep_bf16, num_heads=num_heads))
    assert out_bf16.shape == (B, S, E)
    assert jnp.allclose(out_bf16, ref, rtol=5e-2, atol=5e-2), "bf16 kernel mismatch vs reference"

    print("KERNEL_OK")
</pallas_src>

<mosaic_0001>
module attributes {stable_mosaic.version = 11 : i64} {
  func.func @encoder_layer_kernel(%arg0: i32, %arg1: i32, %arg2: memref<1x8x32xf32, #tpu.memory_space<vmem>>, %arg3: memref<32x32xf32, #tpu.memory_space<vmem>>, %arg4: memref<32x32xf32, #tpu.memory_space<vmem>>, %arg5: memref<32x32xf32, #tpu.memory_space<vmem>>, %arg6: memref<32x32xf32, #tpu.memory_space<vmem>>, %arg7: memref<1x32xf32, #tpu.memory_space<vmem>>, %arg8: memref<1x32xf32, #tpu.memory_space<vmem>>, %arg9: memref<1x32xf32, #tpu.memory_space<vmem>>, %arg10: memref<32x64xf32, #tpu.memory_space<vmem>>, %arg11: memref<1x64xf32, #tpu.memory_space<vmem>>, %arg12: memref<64x32xf32, #tpu.memory_space<vmem>>, %arg13: memref<1x32xf32, #tpu.memory_space<vmem>>, %arg14: memref<1x32xf32, #tpu.memory_space<vmem>>, %arg15: memref<1x32xf32, #tpu.memory_space<vmem>>, %arg16: memref<1x8x32xf32, #tpu.memory_space<vmem>>, %arg17: memref<8x32xf32, #tpu.memory_space<vmem>>, %arg18: memref<8x32xf32, #tpu.memory_space<vmem>>, %arg19: memref<8x32xf32, #tpu.memory_space<vmem>>) attributes {dimension_semantics = [#tpu.dimension_semantics<parallel>, #tpu.dimension_semantics<arbitrary>], iteration_bounds = array<i64: 2, 1>, scalar_prefetch = 0 : i64, scratch_operands = 3 : i64, tpu.core_type = #tpu.core_type<tc>, window_params = [{transform_indices = @transform_0, window_bounds = array<i64: 1, 8, 32>}, {pipeline_mode = #tpu.pipeline_mode<synchronous>, transform_indices = @transform_1, window_bounds = array<i64: 32, 32>}, {pipeline_mode = #tpu.pipeline_mode<synchronous>, transform_indices = @transform_2, window_bounds = array<i64: 32, 32>}, {pipeline_mode = #tpu.pipeline_mode<synchronous>, transform_indices = @transform_3, window_bounds = array<i64: 32, 32>}, {pipeline_mode = #tpu.pipeline_mode<synchronous>, transform_indices = @transform_4, window_bounds = array<i64: 32, 32>}, {pipeline_mode = #tpu.pipeline_mode<synchronous>, transform_indices = @transform_5, window_bounds = array<i64: 1, 32>}, {pipeline_mode = #tpu.pipeline_mode<synchronous>, transform_indices = @transform_6, window_bounds = array<i64: 1, 32>}, {pipeline_mode = #tpu.pipeline_mode<synchronous>, transform_indices = @transform_7, window_bounds = array<i64: 1, 32>}, {pipeline_mode = #tpu.pipeline_mode<synchronous>, transform_indices = @transform_8, window_bounds = array<i64: 32, 64>}, {pipeline_mode = #tpu.pipeline_mode<synchronous>, transform_indices = @transform_9, window_bounds = array<i64: 1, 64>}, {pipeline_mode = #tpu.pipeline_mode<synchronous>, transform_indices = @transform_10, window_bounds = array<i64: 64, 32>}, {pipeline_mode = #tpu.pipeline_mode<synchronous>, transform_indices = @transform_11, window_bounds = array<i64: 1, 32>}, {pipeline_mode = #tpu.pipeline_mode<synchronous>, transform_indices = @transform_12, window_bounds = array<i64: 1, 32>}, {pipeline_mode = #tpu.pipeline_mode<synchronous>, transform_indices = @transform_13, window_bounds = array<i64: 1, 32>}, {transform_indices = @transform_14, window_bounds = array<i64: 1, 8, 32>}]} {
    %c0_i32 = arith.constant 0 : i32
    %0 = arith.cmpi eq, %arg1, %c0_i32 : i32
    %1 = arith.extui %0 : i1 to i32
    %c0_i32_0 = arith.constant 0 : i32
    %2 = arith.cmpi ne, %1, %c0_i32_0 : i32
    scf.if %2 {
      %c0_69 = arith.constant 0 : index
      %c0_70 = arith.constant 0 : index
      %c0_71 = arith.constant 0 : index
      %149 = vector.load %arg2[%c0_69, %c0_70, %c0_71] : memref<1x8x32xf32, #tpu.memory_space<vmem>>, vector<1x8x32xf32>
      %150 = vector.shape_cast %149 : vector<1x8x32xf32> to vector<8x32xf32>
      %c0_72 = arith.constant 0 : index
      %c0_73 = arith.constant 0 : index
      %151 = vector.load %arg4[%c0_72, %c0_73] : memref<32x32xf32, #tpu.memory_space<vmem>>, vector<32x32xf32>
      %cst_74 = arith.constant dense<0.000000e+00> : vector<8x32xf32>
      %152 = tpu.matmul %150, %151, %cst_74 {dimension_numbers = #tpu.dot_dimension_numbers<[1], [0], [0], [1], [0, 0, 1, 1], [], []>} : vector<8x32xf32>, vector<32x32xf32>, vector<8x32xf32> -> vector<8x32xf32>
      %c0_75 = arith.constant 0 : index
      %c0_76 = arith.constant 0 : index
      %153 = vector.load %arg17[%c0_75, %c0_76] : memref<8x32xf32, #tpu.memory_space<vmem>>, vector<8x32xf32>
      tpu.vector_store %arg17[%c0_75, %c0_76], %152 {strides = array<i32>} : memref<8x32xf32, #tpu.memory_space<vmem>>, vector<8x32xf32>,
      %c0_77 = arith.constant 0 : index
      %c0_78 = arith.constant 0 : index
      %154 = vector.load %arg5[%c0_77, %c0_78] : memref<32x32xf32, #tpu.memory_space<vmem>>, vector<32x32xf32>
      %cst_79 = arith.constant dense<0.000000e+00> : vector<8x32xf32>
      %155 = tpu.matmul %150, %154, %cst_79 {dimension_numbers = #tpu.dot_dimension_numbers<[1], [0], [0], [1], [0, 0, 1, 1], [], []>} : vector<8x32xf32>, vector<32x32xf32>, vector<8x32xf32> -> vector<8x32xf32>
      %c0_80 = arith.constant 0 : index
      %c0_81 = arith.constant 0 : index
      %156 = vector.load %arg18[%c0_80, %c0_81] : memref<8x32xf32, #tpu.memory_space<vmem>>, vector<8x32xf32>
      tpu.vector_store %arg18[%c0_80, %c0_81], %155 {strides = array<i32>} : memref<8x32xf32, #tpu.memory_space<vmem>>, vector<8x32xf32>,
    } else {
    }
    %c8_i32 = arith.constant 8 : i32
    %3 = arith.muli %arg1, %c8_i32 : i32
    %4 = tpu.assume_multiple %3, 8 : i32
    %c0 = arith.constant 0 : index
    %5 = arith.index_cast %4 : i32 to index
    %c0_1 = arith.constant 0 : index
    %6 = vector.load %arg2[%c0, %5, %c0_1] : memref<1x8x32xf32, #tpu.memory_space<vmem>>, vector<1x8x32xf32>
    %7 = vector.shape_cast %6 : vector<1x8x32xf32> to vector<8x32xf32>
    %c0_2 = arith.constant 0 : index
    %c0_3 = arith.constant 0 : index
    %8 = vector.load %arg3[%c0_2, %c0_3] : memref<32x32xf32, #tpu.memory_space<vmem>>, vector<32x32xf32>
    %cst = arith.constant dense<0.000000e+00> : vector<8x32xf32>
    %9 = tpu.matmul %7, %8, %cst {dimension_numbers = #tpu.dot_dimension_numbers<[1], [0], [0], [1], [0, 0, 1, 1], [], []>} : vector<8x32xf32>, vector<32x32xf32>, vector<8x32xf32> -> vector<8x32xf32>
    %cst_4 = arith.constant 0.353553385 : f32
    %10 = vector.broadcast %cst_4 : f32 to vector<8x32xf32>
    %11 = arith.mulf %9, %10 : vector<8x32xf32>
    %c0_5 = arith.constant 0 : index
    %c0_6 = arith.constant 0 : index
    %12 = vector.load %arg17[%c0_5, %c0_6] : memref<8x32xf32, #tpu.memory_space<vmem>>, vector<8x32xf32>
    %c0_7 = arith.constant 0 : index
    %c0_8 = arith.constant 0 : index
    %13 = vector.load %arg18[%c0_7, %c0_8] : memref<8x32xf32, #tpu.memory_space<vmem>>, vector<8x32xf32>
    %14 = vector.extract_strided_slice %11 {offsets = [0, 0], sizes = [8, 8], strides = [1, 1]} : vector<8x32xf32> to vector<8x8xf32>
    %15 = vector.extract_strided_slice %12 {offsets = [0, 0], sizes = [8, 8], strides = [1, 1]} : vector<8x32xf32> to vector<8x8xf32>
    %cst_9 = arith.constant dense<0.000000e+00> : vector<8x8xf32>
    %16 = tpu.matmul %14, %15, %cst_9 {dimension_numbers = #tpu.dot_dimension_numbers<[1], [1], [0], [0], [0, 0, 1, 0], [], []>} : vector<8x8xf32>, vector<8x8xf32>, vector<8x8xf32> -> vector<8x8xf32>
    %cst_10 = arith.constant dense<0xFF800000> : vector<8xf32>
    %17 = vector.multi_reduction <maximumf>, %16, %cst_10 [1] : vector<8x8xf32> to vector<8xf32>
    %18 = vector.shape_cast %17 : vector<8xf32> to vector<8x1xf32>
    %19 = vector.broadcast %18 : vector<8x1xf32> to vector<8x8xf32>
    %20 = arith.subf %16, %19 : vector<8x8xf32>
    %21 = math.exp %20 : vector<8x8xf32>
    %cst_11 = arith.constant dense<0.000000e+00> : vector<8xf32>
    %22 = vector.multi_reduction <add>, %21, %cst_11 [1] : vector<8x8xf32> to vector<8xf32>
    %23 = vector.shape_cast %22 : vector<8xf32> to vector<8x1xf32>
    %24 = tpu.reciprocal %23 {approx = true} : vector<8x1xf32> -> vector<8x1xf32>
    %25 = vector.broadcast %24 : vector<8x1xf32> to vector<8x8xf32>
    %26 = arith.mulf %21, %25 : vector<8x8xf32>
    %27 = vector.extract_strided_slice %13 {offsets = [0, 0], sizes = [8, 8], strides = [1, 1]} : vector<8x32xf32> to vector<8x8xf32>
    %cst_12 = arith.constant dense<0.000000e+00> : vector<8x8xf32>
    %28 = tpu.matmul %26, %27, %cst_12 {dimension_numbers = #tpu.dot_dimension_numbers<[1], [0], [0], [1], [0, 0, 1, 1], [], []>} : vector<8x8xf32>, vector<8x8xf32>, vector<8x8xf32> -> vector<8x8xf32>
    %c0_13 = arith.constant 0 : index
    %c0_14 = arith.constant 0 : index
    %29 = vector.load %arg19[%c0_13, %c0_14] : memref<8x32xf32, #tpu.memory_space<vmem>>, vector<8x8xf32>
    tpu.vector_store %arg19[%c0_13, %c0_14], %28 {strides = array<i32>} : memref<8x32xf32, #tpu.memory_space<vmem>>, vector<8x8xf32>,
    %30 = vector.extract_strided_slice %11 {offsets = [0, 8], sizes = [8, 8], strides = [1, 1]} : vector<8x32xf32> to vector<8x8xf32>
    %31 = vector.extract_strided_slice %12 {offsets = [0, 8], sizes = [8, 8], strides = [1, 1]} : vector<8x32xf32> to vector<8x8xf32>
    %cst_15 = arith.constant dense<0.000000e+00> : vector<8x8xf32>
    %32 = tpu.matmul %30, %31, %cst_15 {dimension_numbers = #tpu.dot_dimension_numbers<[1], [1], [0], [0], [0, 0, 1, 0], [], []>} : vector<8x8xf32>, vector<8x8xf32>, vector<8x8xf32> -> vector<8x8xf32>
    %cst_16 = arith.constant dense<0xFF800000> : vector<8xf32>
    %33 = vector.multi_reduction <maximumf>, %32, %cst_16 [1] : vector<8x8xf32> to vector<8xf32>
    %34 = vector.shape_cast %33 : vector<8xf32> to vector<8x1xf32>
    %35 = vector.broadcast %34 : vector<8x1xf32> to vector<8x8xf32>
    %36 = arith.subf %32, %35 : vector<8x8xf32>
    %37 = math.exp %36 : vector<8x8xf32>
    %cst_17 = arith.constant dense<0.000000e+00> : vector<8xf32>
    %38 = vector.multi_reduction <add>, %37, %cst_17 [1] : vector<8x8xf32> to vector<8xf32>
    %39 = vector.shape_cast %38 : vector<8xf32> to vector<8x1xf32>
    %40 = tpu.reciprocal %39 {approx = true} : vector<8x1xf32> -> vector<8x1xf32>
    %41 = vector.broadcast %40 : vector<8x1xf32> to vector<8x8xf32>
    %42 = arith.mulf %37, %41 : vector<8x8xf32>
    %43 = vector.extract_strided_slice %13 {offsets = [0, 8], sizes = [8, 8], strides = [1, 1]} : vector<8x32xf32> to vector<8x8xf32>
    %cst_18 = arith.constant dense<0.000000e+00> : vector<8x8xf32>
    %44 = tpu.matmul %42, %43, %cst_18 {dimension_numbers = #tpu.dot_dimension_numbers<[1], [0], [0], [1], [0, 0, 1, 1], [], []>} : vector<8x8xf32>, vector<8x8xf32>, vector<8x8xf32> -> vector<8x8xf32>
    %c0_19 = arith.constant 0 : index
    %c8 = arith.constant 8 : index
    %45 = vector.load %arg19[%c0_19, %c8] : memref<8x32xf32, #tpu.memory_space<vmem>>, vector<8x8xf32>
    tpu.vector_store %arg19[%c0_19, %c8], %44 {strides = array<i32>} : memref<8x32xf32, #tpu.memory_space<vmem>>, vector<8x8xf32>,
    %46 = vector.extract_strided_slice %11 {offsets = [0, 16], sizes = [8, 8], strides = [1, 1]} : vector<8x32xf32> to vector<8x8xf32>
    %47 = vector.extract_strided_slice %12 {offsets = [0, 16], sizes = [8, 8], strides = [1, 1]} : vector<8x32xf32> to vector<8x8xf32>
    %cst_20 = arith.constant dense<0.000000e+00> : vector<8x8xf32>
    %48 = tpu.matmul %46, %47, %cst_20 {dimension_numbers = #tpu.dot_dimension_numbers<[1], [1], [0], [0], [0, 0, 1, 0], [], []>} : vector<8x8xf32>, vector<8x8xf32>, vector<8x8xf32> -> vector<8x8xf32>
    %cst_21 = arith.constant dense<0xFF800000> : vector<8xf32>
    %49 = vector.multi_reduction <maximumf>, %48, %cst_21 [1] : vector<8x8xf32> to vector<8xf32>
    %50 = vector.shape_cast %49 : vector<8xf32> to vector<8x1xf32>
    %51 = vector.broadcast %50 : vector<8x1xf32> to vector<8x8xf32>
    %52 = arith.subf %48, %51 : vector<8x8xf32>
    %53 = math.exp %52 : vector<8x8xf32>
    %cst_22 = arith.constant dense<0.000000e+00> : vector<8xf32>
    %54 = vector.multi_reduction <add>, %53, %cst_22 [1] : vector<8x8xf32> to vector<8xf32>
    %55 = vector.shape_cast %54 : vector<8xf32> to vector<8x1xf32>
    %56 = tpu.reciprocal %55 {approx = true} : vector<8x1xf32> -> vector<8x1xf32>
    %57 = vector.broadcast %56 : vector<8x1xf32> to vector<8x8xf32>
    %58 = arith.mulf %53, %57 : vector<8x8xf32>
    %59 = vector.extract_strided_slice %13 {offsets = [0, 16], sizes = [8, 8], strides = [1, 1]} : vector<8x32xf32> to vector<8x8xf32>
    %cst_23 = arith.constant dense<0.000000e+00> : vector<8x8xf32>
    %60 = tpu.matmul %58, %59, %cst_23 {dimension_numbers = #tpu.dot_dimension_numbers<[1], [0], [0], [1], [0, 0, 1, 1], [], []>} : vector<8x8xf32>, vector<8x8xf32>, vector<8x8xf32> -> vector<8x8xf32>
    %c0_24 = arith.constant 0 : index
    %c16 = arith.constant 16 : index
    %61 = vector.load %arg19[%c0_24, %c16] : memref<8x32xf32, #tpu.memory_space<vmem>>, vector<8x8xf32>
    tpu.vector_store %arg19[%c0_24, %c16], %60 {strides = array<i32>} : memref<8x32xf32, #tpu.memory_space<vmem>>, vector<8x8xf32>,
    %62 = vector.extract_strided_slice %11 {offsets = [0, 24], sizes = [8, 8], strides = [1, 1]} : vector<8x32xf32> to vector<8x8xf32>
    %63 = vector.extract_strided_slice %12 {offsets = [0, 24], sizes = [8, 8], strides = [1, 1]} : vector<8x32xf32> to vector<8x8xf32>
    %cst_25 = arith.constant dense<0.000000e+00> : vector<8x8xf32>
    %64 = tpu.matmul %62, %63, %cst_25 {dimension_numbers = #tpu.dot_dimension_numbers<[1], [1], [0], [0], [0, 0, 1, 0], [], []>} : vector<8x8xf32>, vector<8x8xf32>, vector<8x8xf32> -> vector<8x8xf32>
    %cst_26 = arith.constant dense<0xFF800000> : vector<8xf32>
    %65 = vector.multi_reduction <maximumf>, %64, %cst_26 [1] : vector<8x8xf32> to vector<8xf32>
    %66 = vector.shape_cast %65 : vector<8xf32> to vector<8x1xf32>
    %67 = vector.broadcast %66 : vector<8x1xf32> to vector<8x8xf32>
    %68 = arith.subf %64, %67 : vector<8x8xf32>
    %69 = math.exp %68 : vector<8x8xf32>
    %cst_27 = arith.constant dense<0.000000e+00> : vector<8xf32>
    %70 = vector.multi_reduction <add>, %69, %cst_27 [1] : vector<8x8xf32> to vector<8xf32>
    %71 = vector.shape_cast %70 : vector<8xf32> to vector<8x1xf32>
    %72 = tpu.reciprocal %71 {approx = true} : vector<8x1xf32> -> vector<8x1xf32>
    %73 = vector.broadcast %72 : vector<8x1xf32> to vector<8x8xf32>
    %74 = arith.mulf %69, %73 : vector<8x8xf32>
    %75 = vector.extract_strided_slice %13 {offsets = [0, 24], sizes = [8, 8], strides = [1, 1]} : vector<8x32xf32> to vector<8x8xf32>
    %cst_28 = arith.constant dense<0.000000e+00> : vector<8x8xf32>
    %76 = tpu.matmul %74, %75, %cst_28 {dimension_numbers = #tpu.dot_dimension_numbers<[1], [0], [0], [1], [0, 0, 1, 1], [], []>} : vector<8x8xf32>, vector<8x8xf32>, vector<8x8xf32> -> vector<8x8xf32>
    %c0_29 = arith.constant 0 : index
    %c24 = arith.constant 24 : index
    %77 = vector.load %arg19[%c0_29, %c24] : memref<8x32xf32, #tpu.memory_space<vmem>>, vector<8x8xf32>
    tpu.vector_store %arg19[%c0_29, %c24], %76 {strides = array<i32>} : memref<8x32xf32, #tpu.memory_space<vmem>>, vector<8x8xf32>,
    %c0_30 = arith.constant 0 : index
    %c0_31 = arith.constant 0 : index
    %78 = vector.load %arg19[%c0_30, %c0_31] : memref<8x32xf32, #tpu.memory_space<vmem>>, vector<8x32xf32>
    %c0_32 = arith.constant 0 : index
    %c0_33 = arith.constant 0 : index
    %79 = vector.load %arg6[%c0_32, %c0_33] : memref<32x32xf32, #tpu.memory_space<vmem>>, vector<32x32xf32>
    %cst_34 = arith.constant dense<0.000000e+00> : vector<8x32xf32>
    %80 = tpu.matmul %78, %79, %cst_34 {dimension_numbers = #tpu.dot_dimension_numbers<[1], [0], [0], [1], [0, 0, 1, 1], [], []>} : vector<8x32xf32>, vector<32x32xf32>, vector<8x32xf32> -> vector<8x32xf32>
    %c0_35 = arith.constant 0 : index
    %c0_36 = arith.constant 0 : index
    %81 = vector.load %arg7[%c0_35, %c0_36] : memref<1x32xf32, #tpu.memory_space<vmem>>, vector<1x32xf32>
    %82 = vector.broadcast %81 : vector<1x32xf32> to vector<8x32xf32>
    %83 = arith.addf %80, %82 : vector<8x32xf32>
    %84 = arith.addf %7, %83 : vector<8x32xf32>
    %c0_37 = arith.constant 0 : index
    %c0_38 = arith.constant 0 : index
    %85 = vector.load %arg8[%c0_37, %c0_38] : memref<1x32xf32, #tpu.memory_space<vmem>>, vector<1x32xf32>
    %c0_39 = arith.constant 0 : index
    %c0_40 = arith.constant 0 : index
    %86 = vector.load %arg9[%c0_39, %c0_40] : memref<1x32xf32, #tpu.memory_space<vmem>>, vector<1x32xf32>
    %cst_41 = arith.constant dense<0.000000e+00> : vector<8xf32>
    %87 = vector.multi_reduction <add>, %84, %cst_41 [1] : vector<8x32xf32> to vector<8xf32>
    %88 = vector.shape_cast %87 : vector<8xf32> to vector<8x1xf32>
    %cst_42 = arith.constant 3.200000e+01 : f32
    %89 = vector.broadcast %cst_42 : f32 to vector<8x1xf32>
    %90 = arith.divf %88, %89 : vector<8x1xf32>
    %91 = vector.broadcast %90 : vector<8x1xf32> to vector<8x32xf32>
    %92 = arith.subf %84, %91 : vector<8x32xf32>
    %93 = arith.mulf %92, %92 : vector<8x32xf32>
    %cst_43 = arith.constant dense<0.000000e+00> : vector<8xf32>
    %94 = vector.multi_reduction <add>, %93, %cst_43 [1] : vector<8x32xf32> to vector<8xf32>
    %95 = vector.shape_cast %94 : vector<8xf32> to vector<8x1xf32>
    %cst_44 = arith.constant 0.0322580636 : f32
    %96 = vector.broadcast %cst_44 : f32 to vector<8x1xf32>
    %97 = arith.mulf %95, %96 : vector<8x1xf32>
    %98 = math.sqrt %97 : vector<8x1xf32>
    %99 = vector.broadcast %90 : vector<8x1xf32> to vector<8x32xf32>
    %100 = arith.subf %84, %99 : vector<8x32xf32>
    %101 = vector.broadcast %85 : vector<1x32xf32> to vector<8x32xf32>
    %102 = arith.mulf %101, %100 : vector<8x32xf32>
    %cst_45 = arith.constant 9.99999997E-7 : f32
    %103 = vector.broadcast %cst_45 : f32 to vector<8x1xf32>
    %104 = arith.addf %98, %103 : vector<8x1xf32>
    %105 = vector.broadcast %104 : vector<8x1xf32> to vector<8x32xf32>
    %106 = arith.divf %102, %105 : vector<8x32xf32>
    %107 = vector.broadcast %86 : vector<1x32xf32> to vector<8x32xf32>
    %108 = arith.addf %106, %107 : vector<8x32xf32>
    %c0_46 = arith.constant 0 : index
    %c0_47 = arith.constant 0 : index
    %109 = vector.load %arg10[%c0_46, %c0_47] : memref<32x64xf32, #tpu.memory_space<vmem>>, vector<32x64xf32>
    %cst_48 = arith.constant dense<0.000000e+00> : vector<8x64xf32>
    %110 = tpu.matmul %108, %109, %cst_48 {dimension_numbers = #tpu.dot_dimension_numbers<[1], [0], [0], [1], [0, 0, 1, 1], [], []>} : vector<8x32xf32>, vector<32x64xf32>, vector<8x64xf32> -> vector<8x64xf32>
    %c0_49 = arith.constant 0 : index
    %c0_50 = arith.constant 0 : index
    %111 = vector.load %arg11[%c0_49, %c0_50] : memref<1x64xf32, #tpu.memory_space<vmem>>, vector<1x64xf32>
    %112 = vector.broadcast %111 : vector<1x64xf32> to vector<8x64xf32>
    %113 = arith.addf %110, %112 : vector<8x64xf32>
    %cst_51 = arith.constant 0.000000e+00 : f32
    %114 = vector.broadcast %cst_51 : f32 to vector<8x64xf32>
    %115 = arith.maximumf %113, %114 : vector<8x64xf32>
    %c0_52 = arith.constant 0 : index
    %c0_53 = arith.constant 0 : index
    %116 = vector.load %arg12[%c0_52, %c0_53] : memref<64x32xf32, #tpu.memory_space<vmem>>, vector<64x32xf32>
    %cst_54 = arith.constant dense<0.000000e+00> : vector<8x32xf32>
    %117 = tpu.matmul %115, %116, %cst_54 {dimension_numbers = #tpu.dot_dimension_numbers<[1], [0], [0], [1], [0, 0, 1, 1], [], []>} : vector<8x64xf32>, vector<64x32xf32>, vector<8x32xf32> -> vector<8x32xf32>
    %c0_55 = arith.constant 0 : index
    %c0_56 = arith.constant 0 : index
    %118 = vector.load %arg13[%c0_55, %c0_56] : memref<1x32xf32, #tpu.memory_space<vmem>>, vector<1x32xf32>
    %119 = vector.broadcast %118 : vector<1x32xf32> to vector<8x32xf32>
    %120 = arith.addf %117, %119 : vector<8x32xf32>
    %121 = arith.addf %108, %120 : vector<8x32xf32>
    %c0_57 = arith.constant 0 : index
    %c0_58 = arith.constant 0 : index
    %122 = vector.load %arg14[%c0_57, %c0_58] : memref<1x32xf32, #tpu.memory_space<vmem>>, vector<1x32xf32>
    %c0_59 = arith.constant 0 : index
    %c0_60 = arith.constant 0 : index
    %123 = vector.load %arg15[%c0_59, %c0_60] : memref<1x32xf32, #tpu.memory_space<vmem>>, vector<1x32xf32>
    %cst_61 = arith.constant dense<0.000000e+00> : vector<8xf32>
    %124 = vector.multi_reduction <add>, %121, %cst_61 [1] : vector<8x32xf32> to vector<8xf32>
    %125 = vector.shape_cast %124 : vector<8xf32> to vector<8x1xf32>
    %cst_62 = arith.constant 3.200000e+01 : f32
    %126 = vector.broadcast %cst_62 : f32 to vector<8x1xf32>
    %127 = arith.divf %125, %126 : vector<8x1xf32>
    %128 = vector.broadcast %127 : vector<8x1xf32> to vector<8x32xf32>
    %129 = arith.subf %121, %128 : vector<8x32xf32>
    %130 = arith.mulf %129, %129 : vector<8x32xf32>
    %cst_63 = arith.constant dense<0.000000e+00> : vector<8xf32>
    %131 = vector.multi_reduction <add>, %130, %cst_63 [1] : vector<8x32xf32> to vector<8xf32>
    %132 = vector.shape_cast %131 : vector<8xf32> to vector<8x1xf32>
    %cst_64 = arith.constant 0.0322580636 : f32
    %133 = vector.broadcast %cst_64 : f32 to vector<8x1xf32>
    %134 = arith.mulf %132, %133 : vector<8x1xf32>
    %135 = math.sqrt %134 : vector<8x1xf32>
    %136 = vector.broadcast %127 : vector<8x1xf32> to vector<8x32xf32>
    %137 = arith.subf %121, %136 : vector<8x32xf32>
    %138 = vector.broadcast %122 : vector<1x32xf32> to vector<8x32xf32>
    %139 = arith.mulf %138, %137 : vector<8x32xf32>
    %cst_65 = arith.constant 9.99999997E-7 : f32
    %140 = vector.broadcast %cst_65 : f32 to vector<8x1xf32>
    %141 = arith.addf %135, %140 : vector<8x1xf32>
    %142 = vector.broadcast %141 : vector<8x1xf32> to vector<8x32xf32>
    %143 = arith.divf %139, %142 : vector<8x32xf32>
    %144 = vector.broadcast %123 : vector<1x32xf32> to vector<8x32xf32>
    %145 = arith.addf %143, %144 : vector<8x32xf32>
    %c0_66 = arith.constant 0 : index
    %c0_67 = arith.constant 0 : index
    %c0_68 = arith.constant 0 : index
    %146 = vector.load %arg16[%c0_66, %c0_67, %c0_68] : memref<1x8x32xf32, #tpu.memory_space<vmem>>, vector<1x8x32xf32>
    %147 = vector.shape_cast %146 : vector<1x8x32xf32> to vector<8x32xf32>
    %148 = vector.shape_cast %145 : vector<8x32xf32> to vector<1x8x32xf32>
    tpu.vector_store %arg16[%c0_66, %c0_67, %c0_68], %148 {strides = array<i32>} : memref<1x8x32xf32, #tpu.memory_space<vmem>>, vector<1x8x32xf32>,
    return
  }
  func.func @transform_0(%arg0: i32, %arg1: i32) -> (i32, i32, i32) {
    %c0_i32 = arith.constant 0 : i32
    %c0_i32_0 = arith.constant 0 : i32
    %c0_i32_1 = arith.constant 0 : i32
    return %arg0, %c0_i32, %c0_i32_0 : i32, i32, i32
  }
  func.func @transform_1(%arg0: i32, %arg1: i32) -> (i32, i32) {
    %c0_i32 = arith.constant 0 : i32
    %c0_i32_0 = arith.constant 0 : i32
    %c0_i32_1 = arith.constant 0 : i32
    return %c0_i32, %c0_i32_0 : i32, i32
  }
  func.func @transform_2(%arg0: i32, %arg1: i32) -> (i32, i32) {
    %c0_i32 = arith.constant 0 : i32
    %c0_i32_0 = arith.constant 0 : i32
    %c0_i32_1 = arith.constant 0 : i32
    return %c0_i32, %c0_i32_0 : i32, i32
  }
  func.func @transform_3(%arg0: i32, %arg1: i32) -> (i32, i32) {
    %c0_i32 = arith.constant 0 : i32
    %c0_i32_0 = arith.constant 0 : i32
    %c0_i32_1 = arith.constant 0 : i32
    return %c0_i32, %c0_i32_0 : i32, i32
  }
  func.func @transform_4(%arg0: i32, %arg1: i32) -> (i32, i32) {
    %c0_i32 = arith.constant 0 : i32
    %c0_i32_0 = arith.constant 0 : i32
    %c0_i32_1 = arith.constant 0 : i32
    return %c0_i32, %c0_i32_0 : i32, i32
  }
  func.func @transform_5(%arg0: i32, %arg1: i32) -> (i32, i32) {
    %c0_i32 = arith.constant 0 : i32
    %c0_i32_0 = arith.constant 0 : i32
    %c0_i32_1 = arith.constant 0 : i32
    return %c0_i32, %c0_i32_0 : i32, i32
  }
  func.func @transform_6(%arg0: i32, %arg1: i32) -> (i32, i32) {
    %c0_i32 = arith.constant 0 : i32
    %c0_i32_0 = arith.constant 0 : i32
    %c0_i32_1 = arith.constant 0 : i32
    return %c0_i32, %c0_i32_0 : i32, i32
  }
  func.func @transform_7(%arg0: i32, %arg1: i32) -> (i32, i32) {
    %c0_i32 = arith.constant 0 : i32
    %c0_i32_0 = arith.constant 0 : i32
    %c0_i32_1 = arith.constant 0 : i32
    return %c0_i32, %c0_i32_0 : i32, i32
  }
  func.func @transform_8(%arg0: i32, %arg1: i32) -> (i32, i32) {
    %c0_i32 = arith.constant 0 : i32
    %c0_i32_0 = arith.constant 0 : i32
    %c0_i32_1 = arith.constant 0 : i32
    return %c0_i32, %c0_i32_0 : i32, i32
  }
  func.func @transform_9(%arg0: i32, %arg1: i32) -> (i32, i32) {
    %c0_i32 = arith.constant 0 : i32
    %c0_i32_0 = arith.constant 0 : i32
    %c0_i32_1 = arith.constant 0 : i32
    return %c0_i32, %c0_i32_0 : i32, i32
  }
  func.func @transform_10(%arg0: i32, %arg1: i32) -> (i32, i32) {
    %c0_i32 = arith.constant 0 : i32
    %c0_i32_0 = arith.constant 0 : i32
    %c0_i32_1 = arith.constant 0 : i32
    return %c0_i32, %c0_i32_0 : i32, i32
  }
  func.func @transform_11(%arg0: i32, %arg1: i32) -> (i32, i32) {
    %c0_i32 = arith.constant 0 : i32
    %c0_i32_0 = arith.constant 0 : i32
    %c0_i32_1 = arith.constant 0 : i32
    return %c0_i32, %c0_i32_0 : i32, i32
  }
  func.func @transform_12(%arg0: i32, %arg1: i32) -> (i32, i32) {
    %c0_i32 = arith.constant 0 : i32
    %c0_i32_0 = arith.constant 0 : i32
    %c0_i32_1 = arith.constant 0 : i32
    return %c0_i32, %c0_i32_0 : i32, i32
  }
  func.func @transform_13(%arg0: i32, %arg1: i32) -> (i32, i32) {
    %c0_i32 = arith.constant 0 : i32
    %c0_i32_0 = arith.constant 0 : i32
    %c0_i32_1 = arith.constant 0 : i32
    return %c0_i32, %c0_i32_0 : i32, i32
  }
  func.func @transform_14(%arg0: i32, %arg1: i32) -> (i32, i32, i32) {
    %c0_i32 = arith.constant 0 : i32
    %c0_i32_0 = arith.constant 0 : i32
    return %arg0, %arg1, %c0_i32 : i32, i32, i32
  }
}

module attributes {stable_mosaic.version = 11 : i64} {
  func.func @encoder_layer_kernel(%arg0: i32, %arg1: i32, %arg2: memref<1x8x32xf32, #tpu.memory_space<vmem>>, %arg3: memref<32x32xf32, #tpu.memory_space<vmem>>, %arg4: memref<32x32xf32, #tpu.memory_space<vmem>>, %arg5: memref<32x32xf32, #tpu.memory_space<vmem>>, %arg6: memref<32x32xf32, #tpu.memory_space<vmem>>, %arg7: memref<1x32xf32, #tpu.memory_space<vmem>>, %arg8: memref<1x32xf32, #tpu.memory_space<vmem>>, %arg9: memref<1x32xf32, #tpu.memory_space<vmem>>, %arg10: memref<32x64xf32, #tpu.memory_space<vmem>>, %arg11: memref<1x64xf32, #tpu.memory_space<vmem>>, %arg12: memref<64x32xf32, #tpu.memory_space<vmem>>, %arg13: memref<1x32xf32, #tpu.memory_space<vmem>>, %arg14: memref<1x32xf32, #tpu.memory_space<vmem>>, %arg15: memref<1x32xf32, #tpu.memory_space<vmem>>, %arg16: memref<1x8x32xf32, #tpu.memory_space<vmem>>, %arg17: memref<8x32xf32, #tpu.memory_space<vmem>>, %arg18: memref<8x32xf32, #tpu.memory_space<vmem>>, %arg19: memref<8x32xf32, #tpu.memory_space<vmem>>) attributes {dimension_semantics = [#tpu.dimension_semantics<parallel>, #tpu.dimension_semantics<arbitrary>], iteration_bounds = array<i64: 2, 1>, scalar_prefetch = 0 : i64, scratch_operands = 3 : i64, tpu.core_type = #tpu.core_type<tc>, window_params = [{transform_indices = @transform_0, window_bounds = array<i64: 1, 8, 32>}, {pipeline_mode = #tpu.pipeline_mode<synchronous>, transform_indices = @transform_1, window_bounds = array<i64: 32, 32>}, {pipeline_mode = #tpu.pipeline_mode<synchronous>, transform_indices = @transform_2, window_bounds = array<i64: 32, 32>}, {pipeline_mode = #tpu.pipeline_mode<synchronous>, transform_indices = @transform_3, window_bounds = array<i64: 32, 32>}, {pipeline_mode = #tpu.pipeline_mode<synchronous>, transform_indices = @transform_4, window_bounds = array<i64: 32, 32>}, {pipeline_mode = #tpu.pipeline_mode<synchronous>, transform_indices = @transform_5, window_bounds = array<i64: 1, 32>}, {pipeline_mode = #tpu.pipeline_mode<synchronous>, transform_indices = @transform_6, window_bounds = array<i64: 1, 32>}, {pipeline_mode = #tpu.pipeline_mode<synchronous>, transform_indices = @transform_7, window_bounds = array<i64: 1, 32>}, {pipeline_mode = #tpu.pipeline_mode<synchronous>, transform_indices = @transform_8, window_bounds = array<i64: 32, 64>}, {pipeline_mode = #tpu.pipeline_mode<synchronous>, transform_indices = @transform_9, window_bounds = array<i64: 1, 64>}, {pipeline_mode = #tpu.pipeline_mode<synchronous>, transform_indices = @transform_10, window_bounds = array<i64: 64, 32>}, {pipeline_mode = #tpu.pipeline_mode<synchronous>, transform_indices = @transform_11, window_bounds = array<i64: 1, 32>}, {pipeline_mode = #tpu.pipeline_mode<synchronous>, transform_indices = @transform_12, window_bounds = array<i64: 1, 32>}, {pipeline_mode = #tpu.pipeline_mode<synchronous>, transform_indices = @transform_13, window_bounds = array<i64: 1, 32>}, {transform_indices = @transform_14, window_bounds = array<i64: 1, 8, 32>}]} {
    %c0_i32 = arith.constant 0 : i32
    %0 = arith.cmpi eq, %arg1, %c0_i32 : i32
    %1 = arith.extui %0 : i1 to i32
    %c0_i32_0 = arith.constant 0 : i32
    %2 = arith.cmpi ne, %1, %c0_i32_0 : i32
    scf.if %2 {
      %c0_69 = arith.constant 0 : index
      %c0_70 = arith.constant 0 : index
      %c0_71 = arith.constant 0 : index
      %149 = vector.load %arg2[%c0_69, %c0_70, %c0_71] : memref<1x8x32xf32, #tpu.memory_space<vmem>>, vector<1x8x32xf32>
      %150 = vector.shape_cast %149 : vector<1x8x32xf32> to vector<8x32xf32>
      %c0_72 = arith.constant 0 : index
      %c0_73 = arith.constant 0 : index
      %151 = vector.load %arg4[%c0_72, %c0_73] : memref<32x32xf32, #tpu.memory_space<vmem>>, vector<32x32xf32>
      %cst_74 = arith.constant dense<0.000000e+00> : vector<8x32xf32>
      %152 = tpu.matmul %150, %151, %cst_74 {dimension_numbers = #tpu.dot_dimension_numbers<[1], [0], [0], [1], [0, 0, 1, 1], [], []>} : vector<8x32xf32>, vector<32x32xf32>, vector<8x32xf32> -> vector<8x32xf32>
      %c0_75 = arith.constant 0 : index
      %c0_76 = arith.constant 0 : index
      %153 = vector.load %arg17[%c0_75, %c0_76] : memref<8x32xf32, #tpu.memory_space<vmem>>, vector<8x32xf32>
      tpu.vector_store %arg17[%c0_75, %c0_76], %152 {strides = array<i32>} : memref<8x32xf32, #tpu.memory_space<vmem>>, vector<8x32xf32>,
      %c0_77 = arith.constant 0 : index
      %c0_78 = arith.constant 0 : index
      %154 = vector.load %arg5[%c0_77, %c0_78] : memref<32x32xf32, #tpu.memory_space<vmem>>, vector<32x32xf32>
      %cst_79 = arith.constant dense<0.000000e+00> : vector<8x32xf32>
      %155 = tpu.matmul %150, %154, %cst_79 {dimension_numbers = #tpu.dot_dimension_numbers<[1], [0], [0], [1], [0, 0, 1, 1], [], []>} : vector<8x32xf32>, vector<32x32xf32>, vector<8x32xf32> -> vector<8x32xf32>
      %c0_80 = arith.constant 0 : index
      %c0_81 = arith.constant 0 : index
      %156 = vector.load %arg18[%c0_80, %c0_81] : memref<8x32xf32, #tpu.memory_space<vmem>>, vector<8x32xf32>
      tpu.vector_store %arg18[%c0_80, %c0_81], %155 {strides = array<i32>} : memref<8x32xf32, #tpu.memory_space<vmem>>, vector<8x32xf32>,
    } else {
    }
    %c8_i32 = arith.constant 8 : i32
    %3 = arith.muli %arg1, %c8_i32 : i32
    %4 = tpu.assume_multiple %3, 8 : i32
    %c0 = arith.constant 0 : index
    %5 = arith.index_cast %4 : i32 to index
    %c0_1 = arith.constant 0 : index
    %6 = vector.load %arg2[%c0, %5, %c0_1] : memref<1x8x32xf32, #tpu.memory_space<vmem>>, vector<1x8x32xf32>
    %7 = vector.shape_cast %6 : vector<1x8x32xf32> to vector<8x32xf32>
    %c0_2 = arith.constant 0 : index
    %c0_3 = arith.constant 0 : index
    %8 = vector.load %arg3[%c0_2, %c0_3] : memref<32x32xf32, #tpu.memory_space<vmem>>, vector<32x32xf32>
    %cst = arith.constant dense<0.000000e+00> : vector<8x32xf32>
    %9 = tpu.matmul %7, %8, %cst {dimension_numbers = #tpu.dot_dimension_numbers<[1], [0], [0], [1], [0, 0, 1, 1], [], []>} : vector<8x32xf32>, vector<32x32xf32>, vector<8x32xf32> -> vector<8x32xf32>
    %cst_4 = arith.constant 0.353553385 : f32
    %10 = vector.broadcast %cst_4 : f32 to vector<8x32xf32>
    %11 = arith.mulf %9, %10 : vector<8x32xf32>
    %c0_5 = arith.constant 0 : index
    %c0_6 = arith.constant 0 : index
    %12 = vector.load %arg17[%c0_5, %c0_6] : memref<8x32xf32, #tpu.memory_space<vmem>>, vector<8x32xf32>
    %c0_7 = arith.constant 0 : index
    %c0_8 = arith.constant 0 : index
    %13 = vector.load %arg18[%c0_7, %c0_8] : memref<8x32xf32, #tpu.memory_space<vmem>>, vector<8x32xf32>
    %14 = vector.extract_strided_slice %11 {offsets = [0, 0], sizes = [8, 8], strides = [1, 1]} : vector<8x32xf32> to vector<8x8xf32>
    %15 = vector.extract_strided_slice %12 {offsets = [0, 0], sizes = [8, 8], strides = [1, 1]} : vector<8x32xf32> to vector<8x8xf32>
    %cst_9 = arith.constant dense<0.000000e+00> : vector<8x8xf32>
    %16 = tpu.matmul %14, %15, %cst_9 {dimension_numbers = #tpu.dot_dimension_numbers<[1], [1], [0], [0], [0, 0, 1, 0], [], []>} : vector<8x8xf32>, vector<8x8xf32>, vector<8x8xf32> -> vector<8x8xf32>
    %cst_10 = arith.constant dense<0xFF800000> : vector<8xf32>
    %17 = vector.multi_reduction <maximumf>, %16, %cst_10 [1] : vector<8x8xf32> to vector<8xf32>
    %18 = vector.shape_cast %17 : vector<8xf32> to vector<8x1xf32>
    %19 = vector.broadcast %18 : vector<8x1xf32> to vector<8x8xf32>
    %20 = arith.subf %16, %19 : vector<8x8xf32>
    %21 = math.exp %20 : vector<8x8xf32>
    %cst_11 = arith.constant dense<0.000000e+00> : vector<8xf32>
    %22 = vector.multi_reduction <add>, %21, %cst_11 [1] : vector<8x8xf32> to vector<8xf32>
    %23 = vector.shape_cast %22 : vector<8xf32> to vector<8x1xf32>
    %24 = tpu.reciprocal %23 {approx = true} : vector<8x1xf32> -> vector<8x1xf32>
    %25 = vector.broadcast %24 : vector<8x1xf32> to vector<8x8xf32>
    %26 = arith.mulf %21, %25 : vector<8x8xf32>
    %27 = vector.extract_strided_slice %13 {offsets = [0, 0], sizes = [8, 8], strides = [1, 1]} : vector<8x32xf32> to vector<8x8xf32>
    %cst_12 = arith.constant dense<0.000000e+00> : vector<8x8xf32>
    %28 = tpu.matmul %26, %27, %cst_12 {dimension_numbers = #tpu.dot_dimension_numbers<[1], [0], [0], [1], [0, 0, 1, 1], [], []>} : vector<8x8xf32>, vector<8x8xf32>, vector<8x8xf32> -> vector<8x8xf32>
    %c0_13 = arith.constant 0 : index
    %c0_14 = arith.constant 0 : index
    %29 = vector.load %arg19[%c0_13, %c0_14] : memref<8x32xf32, #tpu.memory_space<vmem>>, vector<8x8xf32>
    tpu.vector_store %arg19[%c0_13, %c0_14], %28 {strides = array<i32>} : memref<8x32xf32, #tpu.memory_space<vmem>>, vector<8x8xf32>,
    %30 = vector.extract_strided_slice %11 {offsets = [0, 8], sizes = [8, 8], strides = [1, 1]} : vector<8x32xf32> to vector<8x8xf32>
    %31 = vector.extract_strided_slice %12 {offsets = [0, 8], sizes = [8, 8], strides = [1, 1]} : vector<8x32xf32> to vector<8x8xf32>
    %cst_15 = arith.constant dense<0.000000e+00> : vector<8x8xf32>
    %32 = tpu.matmul %30, %31, %cst_15 {dimension_numbers = #tpu.dot_dimension_numbers<[1], [1], [0], [0], [0, 0, 1, 0], [], []>} : vector<8x8xf32>, vector<8x8xf32>, vector<8x8xf32> -> vector<8x8xf32>
    %cst_16 = arith.constant dense<0xFF800000> : vector<8xf32>
    %33 = vector.multi_reduction <maximumf>, %32, %cst_16 [1] : vector<8x8xf32> to vector<8xf32>
    %34 = vector.shape_cast %33 : vector<8xf32> to vector<8x1xf32>
    %35 = vector.broadcast %34 : vector<8x1xf32> to vector<8x8xf32>
    %36 = arith.subf %32, %35 : vector<8x8xf32>
    %37 = math.exp %36 : vector<8x8xf32>
    %cst_17 = arith.constant dense<0.000000e+00> : vector<8xf32>
    %38 = vector.multi_reduction <add>, %37, %cst_17 [1] : vector<8x8xf32> to vector<8xf32>
    %39 = vector.shape_cast %38 : vector<8xf32> to vector<8x1xf32>
    %40 = tpu.reciprocal %39 {approx = true} : vector<8x1xf32> -> vector<8x1xf32>
    %41 = vector.broadcast %40 : vector<8x1xf32> to vector<8x8xf32>
    %42 = arith.mulf %37, %41 : vector<8x8xf32>
    %43 = vector.extract_strided_slice %13 {offsets = [0, 8], sizes = [8, 8], strides = [1, 1]} : vector<8x32xf32> to vector<8x8xf32>
    %cst_18 = arith.constant dense<0.000000e+00> : vector<8x8xf32>
    %44 = tpu.matmul %42, %43, %cst_18 {dimension_numbers = #tpu.dot_dimension_numbers<[1], [0], [0], [1], [0, 0, 1, 1], [], []>} : vector<8x8xf32>, vector<8x8xf32>, vector<8x8xf32> -> vector<8x8xf32>
    %c0_19 = arith.constant 0 : index
    %c8 = arith.constant 8 : index
    %45 = vector.load %arg19[%c0_19, %c8] : memref<8x32xf32, #tpu.memory_space<vmem>>, vector<8x8xf32>
    tpu.vector_store %arg19[%c0_19, %c8], %44 {strides = array<i32>} : memref<8x32xf32, #tpu.memory_space<vmem>>, vector<8x8xf32>,
    %46 = vector.extract_strided_slice %11 {offsets = [0, 16], sizes = [8, 8], strides = [1, 1]} : vector<8x32xf32> to vector<8x8xf32>
    %47 = vector.extract_strided_slice %12 {offsets = [0, 16], sizes = [8, 8], strides = [1, 1]} : vector<8x32xf32> to vector<8x8xf32>
    %cst_20 = arith.constant dense<0.000000e+00> : vector<8x8xf32>
    %48 = tpu.matmul %46, %47, %cst_20 {dimension_numbers = #tpu.dot_dimension_numbers<[1], [1], [0], [0], [0, 0, 1, 0], [], []>} : vector<8x8xf32>, vector<8x8xf32>, vector<8x8xf32> -> vector<8x8xf32>
    %cst_21 = arith.constant dense<0xFF800000> : vector<8xf32>
    %49 = vector.multi_reduction <maximumf>, %48, %cst_21 [1] : vector<8x8xf32> to vector<8xf32>
    %50 = vector.shape_cast %49 : vector<8xf32> to vector<8x1xf32>
    %51 = vector.broadcast %50 : vector<8x1xf32> to vector<8x8xf32>
    %52 = arith.subf %48, %51 : vector<8x8xf32>
    %53 = math.exp %52 : vector<8x8xf32>
    %cst_22 = arith.constant dense<0.000000e+00> : vector<8xf32>
    %54 = vector.multi_reduction <add>, %53, %cst_22 [1] : vector<8x8xf32> to vector<8xf32>
    %55 = vector.shape_cast %54 : vector<8xf32> to vector<8x1xf32>
    %56 = tpu.reciprocal %55 {approx = true} : vector<8x1xf32> -> vector<8x1xf32>
    %57 = vector.broadcast %56 : vector<8x1xf32> to vector<8x8xf32>
    %58 = arith.mulf %53, %57 : vector<8x8xf32>
    %59 = vector.extract_strided_slice %13 {offsets = [0, 16], sizes = [8, 8], strides = [1, 1]} : vector<8x32xf32> to vector<8x8xf32>
    %cst_23 = arith.constant dense<0.000000e+00> : vector<8x8xf32>
    %60 = tpu.matmul %58, %59, %cst_23 {dimension_numbers = #tpu.dot_dimension_numbers<[1], [0], [0], [1], [0, 0, 1, 1], [], []>} : vector<8x8xf32>, vector<8x8xf32>, vector<8x8xf32> -> vector<8x8xf32>
    %c0_24 = arith.constant 0 : index
    %c16 = arith.constant 16 : index
    %61 = vector.load %arg19[%c0_24, %c16] : memref<8x32xf32, #tpu.memory_space<vmem>>, vector<8x8xf32>
    tpu.vector_store %arg19[%c0_24, %c16], %60 {strides = array<i32>} : memref<8x32xf32, #tpu.memory_space<vmem>>, vector<8x8xf32>,
    %62 = vector.extract_strided_slice %11 {offsets = [0, 24], sizes = [8, 8], strides = [1, 1]} : vector<8x32xf32> to vector<8x8xf32>
    %63 = vector.extract_strided_slice %12 {offsets = [0, 24], sizes = [8, 8], strides = [1, 1]} : vector<8x32xf32> to vector<8x8xf32>
    %cst_25 = arith.constant dense<0.000000e+00> : vector<8x8xf32>
    %64 = tpu.matmul %62, %63, %cst_25 {dimension_numbers = #tpu.dot_dimension_numbers<[1], [1], [0], [0], [0, 0, 1, 0], [], []>} : vector<8x8xf32>, vector<8x8xf32>, vector<8x8xf32> -> vector<8x8xf32>
    %cst_26 = arith.constant dense<0xFF800000> : vector<8xf32>
    %65 = vector.multi_reduction <maximumf>, %64, %cst_26 [1] : vector<8x8xf32> to vector<8xf32>
    %66 = vector.shape_cast %65 : vector<8xf32> to vector<8x1xf32>
    %67 = vector.broadcast %66 : vector<8x1xf32> to vector<8x8xf32>
    %68 = arith.subf %64, %67 : vector<8x8xf32>
    %69 = math.exp %68 : vector<8x8xf32>
    %cst_27 = arith.constant dense<0.000000e+00> : vector<8xf32>
    %70 = vector.multi_reduction <add>, %69, %cst_27 [1] : vector<8x8xf32> to vector<8xf32>
    %71 = vector.shape_cast %70 : vector<8xf32> to vector<8x1xf32>
    %72 = tpu.reciprocal %71 {approx = true} : vector<8x1xf32> -> vector<8x1xf32>
    %73 = vector.broadcast %72 : vector<8x1xf32> to vector<8x8xf32>
    %74 = arith.mulf %69, %73 : vector<8x8xf32>
    %75 = vector.extract_strided_slice %13 {offsets = [0, 24], sizes = [8, 8], strides = [1, 1]} : vector<8x32xf32> to vector<8x8xf32>
    %cst_28 = arith.constant dense<0.000000e+00> : vector<8x8xf32>
    %76 = tpu.matmul %74, %75, %cst_28 {dimension_numbers = #tpu.dot_dimension_numbers<[1], [0], [0], [1], [0, 0, 1, 1], [], []>} : vector<8x8xf32>, vector<8x8xf32>, vector<8x8xf32> -> vector<8x8xf32>
    %c0_29 = arith.constant 0 : index
    %c24 = arith.constant 24 : index
    %77 = vector.load %arg19[%c0_29, %c24] : memref<8x32xf32, #tpu.memory_space<vmem>>, vector<8x8xf32>
    tpu.vector_store %arg19[%c0_29, %c24], %76 {strides = array<i32>} : memref<8x32xf32, #tpu.memory_space<vmem>>, vector<8x8xf32>,
    %c0_30 = arith.constant 0 : index
    %c0_31 = arith.constant 0 : index
    %78 = vector.load %arg19[%c0_30, %c0_31] : memref<8x32xf32, #tpu.memory_space<vmem>>, vector<8x32xf32>
    %c0_32 = arith.constant 0 : index
    %c0_33 = arith.constant 0 : index
    %79 = vector.load %arg6[%c0_32, %c0_33] : memref<32x32xf32, #tpu.memory_space<vmem>>, vector<32x32xf32>
    %cst_34 = arith.constant dense<0.000000e+00> : vector<8x32xf32>
    %80 = tpu.matmul %78, %79, %cst_34 {dimension_numbers = #tpu.dot_dimension_numbers<[1], [0], [0], [1], [0, 0, 1, 1], [], []>} : vector<8x32xf32>, vector<32x32xf32>, vector<8x32xf32> -> vector<8x32xf32>
    %c0_35 = arith.constant 0 : index
    %c0_36 = arith.constant 0 : index
    %81 = vector.load %arg7[%c0_35, %c0_36] : memref<1x32xf32, #tpu.memory_space<vmem>>, vector<1x32xf32>
    %82 = vector.broadcast %81 : vector<1x32xf32> to vector<8x32xf32>
    %83 = arith.addf %80, %82 : vector<8x32xf32>
    %84 = arith.addf %7, %83 : vector<8x32xf32>
    %c0_37 = arith.constant 0 : index
    %c0_38 = arith.constant 0 : index
    %85 = vector.load %arg8[%c0_37, %c0_38] : memref<1x32xf32, #tpu.memory_space<vmem>>, vector<1x32xf32>
    %c0_39 = arith.constant 0 : index
    %c0_40 = arith.constant 0 : index
    %86 = vector.load %arg9[%c0_39, %c0_40] : memref<1x32xf32, #tpu.memory_space<vmem>>, vector<1x32xf32>
    %cst_41 = arith.constant dense<0.000000e+00> : vector<8xf32>
    %87 = vector.multi_reduction <add>, %84, %cst_41 [1] : vector<8x32xf32> to vector<8xf32>
    %88 = vector.shape_cast %87 : vector<8xf32> to vector<8x1xf32>
    %cst_42 = arith.constant 3.200000e+01 : f32
    %89 = vector.broadcast %cst_42 : f32 to vector<8x1xf32>
    %90 = arith.divf %88, %89 : vector<8x1xf32>
    %91 = vector.broadcast %90 : vector<8x1xf32> to vector<8x32xf32>
    %92 = arith.subf %84, %91 : vector<8x32xf32>
    %93 = arith.mulf %92, %92 : vector<8x32xf32>
    %cst_43 = arith.constant dense<0.000000e+00> : vector<8xf32>
    %94 = vector.multi_reduction <add>, %93, %cst_43 [1] : vector<8x32xf32> to vector<8xf32>
    %95 = vector.shape_cast %94 : vector<8xf32> to vector<8x1xf32>
    %cst_44 = arith.constant 0.0322580636 : f32
    %96 = vector.broadcast %cst_44 : f32 to vector<8x1xf32>
    %97 = arith.mulf %95, %96 : vector<8x1xf32>
    %98 = math.sqrt %97 : vector<8x1xf32>
    %99 = vector.broadcast %90 : vector<8x1xf32> to vector<8x32xf32>
    %100 = arith.subf %84, %99 : vector<8x32xf32>
    %101 = vector.broadcast %85 : vector<1x32xf32> to vector<8x32xf32>
    %102 = arith.mulf %101, %100 : vector<8x32xf32>
    %cst_45 = arith.constant 9.99999997E-7 : f32
    %103 = vector.broadcast %cst_45 : f32 to vector<8x1xf32>
    %104 = arith.addf %98, %103 : vector<8x1xf32>
    %105 = vector.broadcast %104 : vector<8x1xf32> to vector<8x32xf32>
    %106 = arith.divf %102, %105 : vector<8x32xf32>
    %107 = vector.broadcast %86 : vector<1x32xf32> to vector<8x32xf32>
    %108 = arith.addf %106, %107 : vector<8x32xf32>
    %c0_46 = arith.constant 0 : index
    %c0_47 = arith.constant 0 : index
    %109 = vector.load %arg10[%c0_46, %c0_47] : memref<32x64xf32, #tpu.memory_space<vmem>>, vector<32x64xf32>
    %cst_48 = arith.constant dense<0.000000e+00> : vector<8x64xf32>
    %110 = tpu.matmul %108, %109, %cst_48 {dimension_numbers = #tpu.dot_dimension_numbers<[1], [0], [0], [1], [0, 0, 1, 1], [], []>} : vector<8x32xf32>, vector<32x64xf32>, vector<8x64xf32> -> vector<8x64xf32>
    %c0_49 = arith.constant 0 : index
    %c0_50 = arith.constant 0 : index
    %111 = vector.load %arg11[%c0_49, %c0_50] : memref<1x64xf32, #tpu.memory_space<vmem>>, vector<1x64xf32>
    %112 = vector.broadcast %111 : vector<1x64xf32> to vector<8x64xf32>
    %113 = arith.addf %110, %112 : vector<8x64xf32>
    %cst_51 = arith.constant 0.000000e+00 : f32
    %114 = vector.broadcast %cst_51 : f32 to vector<8x64xf32>
    %115 = arith.maximumf %113, %114 : vector<8x64xf32>
    %c0_52 = arith.constant 0 : index
    %c0_53 = arith.constant 0 : index
    %116 = vector.load %arg12[%c0_52, %c0_53] : memref<64x32xf32, #tpu.memory_space<vmem>>, vector<64x32xf32>
    %cst_54 = arith.constant dense<0.000000e+00> : vector<8x32xf32>
    %117 = tpu.matmul %115, %116, %cst_54 {dimension_numbers = #tpu.dot_dimension_numbers<[1], [0], [0], [1], [0, 0, 1, 1], [], []>} : vector<8x64xf32>, vector<64x32xf32>, vector<8x32xf32> -> vector<8x32xf32>
    %c0_55 = arith.constant 0 : index
    %c0_56 = arith.constant 0 : index
    %118 = vector.load %arg13[%c0_55, %c0_56] : memref<1x32xf32, #tpu.memory_space<vmem>>, vector<1x32xf32>
    %119 = vector.broadcast %118 : vector<1x32xf32> to vector<8x32xf32>
    %120 = arith.addf %117, %119 : vector<8x32xf32>
    %121 = arith.addf %108, %120 : vector<8x32xf32>
    %c0_57 = arith.constant 0 : index
    %c0_58 = arith.constant 0 : index
    %122 = vector.load %arg14[%c0_57, %c0_58] : memref<1x32xf32, #tpu.memory_space<vmem>>, vector<1x32xf32>
    %c0_59 = arith.constant 0 : index
    %c0_60 = arith.constant 0 : index
    %123 = vector.load %arg15[%c0_59, %c0_60] : memref<1x32xf32, #tpu.memory_space<vmem>>, vector<1x32xf32>
    %cst_61 = arith.constant dense<0.000000e+00> : vector<8xf32>
    %124 = vector.multi_reduction <add>, %121, %cst_61 [1] : vector<8x32xf32> to vector<8xf32>
    %125 = vector.shape_cast %124 : vector<8xf32> to vector<8x1xf32>
    %cst_62 = arith.constant 3.200000e+01 : f32
    %126 = vector.broadcast %cst_62 : f32 to vector<8x1xf32>
    %127 = arith.divf %125, %126 : vector<8x1xf32>
    %128 = vector.broadcast %127 : vector<8x1xf32> to vector<8x32xf32>
    %129 = arith.subf %121, %128 : vector<8x32xf32>
    %130 = arith.mulf %129, %129 : vector<8x32xf32>
    %cst_63 = arith.constant dense<0.000000e+00> : vector<8xf32>
    %131 = vector.multi_reduction <add>, %130, %cst_63 [1] : vector<8x32xf32> to vector<8xf32>
    %132 = vector.shape_cast %131 : vector<8xf32> to vector<8x1xf32>
    %cst_64 = arith.constant 0.0322580636 : f32
    %133 = vector.broadcast %cst_64 : f32 to vector<8x1xf32>
    %134 = arith.mulf %132, %133 : vector<8x1xf32>
    %135 = math.sqrt %134 : vector<8x1xf32>
    %136 = vector.broadcast %127 : vector<8x1xf32> to vector<8x32xf32>
    %137 = arith.subf %121, %136 : vector<8x32xf32>
    %138 = vector.broadcast %122 : vector<1x32xf32> to vector<8x32xf32>
    %139 = arith.mulf %138, %137 : vector<8x32xf32>
    %cst_65 = arith.constant 9.99999997E-7 : f32
    %140 = vector.broadcast %cst_65 : f32 to vector<8x1xf32>
    %141 = arith.addf %135, %140 : vector<8x1xf32>
    %142 = vector.broadcast %141 : vector<8x1xf32> to vector<8x32xf32>
    %143 = arith.divf %139, %142 : vector<8x32xf32>
    %144 = vector.broadcast %123 : vector<1x32xf32> to vector<8x32xf32>
    %145 = arith.addf %143, %144 : vector<8x32xf32>
    %c0_66 = arith.constant 0 : index
    %c0_67 = arith.constant 0 : index
    %c0_68 = arith.constant 0 : index
    %146 = vector.load %arg16[%c0_66, %c0_67, %c0_68] : memref<1x8x32xf32, #tpu.memory_space<vmem>>, vector<1x8x32xf32>
    %147 = vector.shape_cast %146 : vector<1x8x32xf32> to vector<8x32xf32>
    %148 = vector.shape_cast %145 : vector<8x32xf32> to vector<1x8x32xf32>
    tpu.vector_store %arg16[%c0_66, %c0_67, %c0_68], %148 {strides = array<i32>} : memref<1x8x32xf32, #tpu.memory_space<vmem>>, vector<1x8x32xf32>,
    return
  }
  func.func @transform_0(%arg0: i32, %arg1: i32) -> (i32, i32, i32) {
    %c0_i32 = arith.constant 0 : i32
    %c0_i32_0 = arith.constant 0 : i32
    %c0_i32_1 = arith.constant 0 : i32
    return %arg0, %c0_i32, %c0_i32_0 : i32, i32, i32
  }
  func.func @transform_1(%arg0: i32, %arg1: i32) -> (i32, i32) {
    %c0_i32 = arith.constant 0 : i32
    %c0_i32_0 = arith.constant 0 : i32
    %c0_i32_1 = arith.constant 0 : i32
    return %c0_i32, %c0_i32_0 : i32, i32
  }
  func.func @transform_2(%arg0: i32, %arg1: i32) -> (i32, i32) {
    %c0_i32 = arith.constant 0 : i32
    %c0_i32_0 = arith.constant 0 : i32
    %c0_i32_1 = arith.constant 0 : i32
    return %c0_i32, %c0_i32_0 : i32, i32
  }
  func.func @transform_3(%arg0: i32, %arg1: i32) -> (i32, i32) {
    %c0_i32 = arith.constant 0 : i32
    %c0_i32_0 = arith.constant 0 : i32
    %c0_i32_1 = arith.constant 0 : i32
    return %c0_i32, %c0_i32_0 : i32, i32
  }
  func.func @transform_4(%arg0: i32, %arg1: i32) -> (i32, i32) {
    %c0_i32 = arith.constant 0 : i32
    %c0_i32_0 = arith.constant 0 : i32
    %c0_i32_1 = arith.constant 0 : i32
    return %c0_i32, %c0_i32_0 : i32, i32
  }
  func.func @transform_5(%arg0: i32, %arg1: i32) -> (i32, i32) {
    %c0_i32 = arith.constant 0 : i32
    %c0_i32_0 = arith.constant 0 : i32
    %c0_i32_1 = arith.constant 0 : i32
    return %c0_i32, %c0_i32_0 : i32, i32
  }
  func.func @transform_6(%arg0: i32, %arg1: i32) -> (i32, i32) {
    %c0_i32 = arith.constant 0 : i32
    %c0_i32_0 = arith.constant 0 : i32
    %c0_i32_1 = arith.constant 0 : i32
    return %c0_i32, %c0_i32_0 : i32, i32
  }
  func.func @transform_7(%arg0: i32, %arg1: i32) -> (i32, i32) {
    %c0_i32 = arith.constant 0 : i32
    %c0_i32_0 = arith.constant 0 : i32
    %c0_i32_1 = arith.constant 0 : i32
    return %c0_i32, %c0_i32_0 : i32, i32
  }
  func.func @transform_8(%arg0: i32, %arg1: i32) -> (i32, i32) {
    %c0_i32 = arith.constant 0 : i32
    %c0_i32_0 = arith.constant 0 : i32
    %c0_i32_1 = arith.constant 0 : i32
    return %c0_i32, %c0_i32_0 : i32, i32
  }
  func.func @transform_9(%arg0: i32, %arg1: i32) -> (i32, i32) {
    %c0_i32 = arith.constant 0 : i32
    %c0_i32_0 = arith.constant 0 : i32
    %c0_i32_1 = arith.constant 0 : i32
    return %c0_i32, %c0_i32_0 : i32, i32
  }
  func.func @transform_10(%arg0: i32, %arg1: i32) -> (i32, i32) {
    %c0_i32 = arith.constant 0 : i32
    %c0_i32_0 = arith.constant 0 : i32
    %c0_i32_1 = arith.constant 0 : i32
    return %c0_i32, %c0_i32_0 : i32, i32
  }
  func.func @transform_11(%arg0: i32, %arg1: i32) -> (i32, i32) {
    %c0_i32 = arith.constant 0 : i32
    %c0_i32_0 = arith.constant 0 : i32
    %c0_i32_1 = arith.constant 0 : i32
    return %c0_i32, %c0_i32_0 : i32, i32
  }
  func.func @transform_12(%arg0: i32, %arg1: i32) -> (i32, i32) {
    %c0_i32 = arith.constant 0 : i32
    %c0_i32_0 = arith.constant 0 : i32
    %c0_i32_1 = arith.constant 0 : i32
    return %c0_i32, %c0_i32_0 : i32, i32
  }
  func.func @transform_13(%arg0: i32, %arg1: i32) -> (i32, i32) {
    %c0_i32 = arith.constant 0 : i32
    %c0_i32_0 = arith.constant 0 : i32
    %c0_i32_1 = arith.constant 0 : i32
    return %c0_i32, %c0_i32_0 : i32, i32
  }
  func.func @transform_14(%arg0: i32, %arg1: i32) -> (i32, i32, i32) {
    %c0_i32 = arith.constant 0 : i32
    %c0_i32_0 = arith.constant 0 : i32
    return %arg0, %arg1, %c0_i32 : i32, i32, i32
  }
}

</mosaic_0001>

<bundles_post_ra>
// kernel: tpu_custom_call.1
= control target key start
LH: loop header
LB: loop body
LE: loop exit
PB: predicated region body
PF: predicated region fallthrough
CT: control target
= control target key end

     0   :  { %s2961_s0 = inlined_call_operand.hbm [shape: f32[2,8,32], index: 0, kind: input, shape index: {}]   ;;  %s2962_s1 = inlined_call_operand.vmem [shape: f32[32,32], index: 1, kind: input, shape index: {}]   ;;  %s2963_s2 = inlined_call_operand.vmem [shape: f32[32,32], index: 2, kind: input, shape index: {}]   ;;  %s2964_s3 = inlined_call_operand.vmem [shape: f32[32,32], index: 3, kind: input, shape index: {}]   ;;  %s2965_s4 = inlined_call_operand.hbm [shape: f32[32,32], index: 4, kind: input, shape index: {}]   ;;  %s2966_s5 = inlined_call_operand.vmem [shape: f32[1,32], index: 5, kind: input, shape index: {}]   ;;  %s2967_s6 = inlined_call_operand.vmem [shape: f32[1,32], index: 6, kind: input, shape index: {}]   ;;  %s2968_s7 = inlined_call_operand.vmem [shape: f32[1,32], index: 7, kind: input, shape index: {}]   ;;  %s2969_s8 = inlined_call_operand.hbm [shape: f32[32,64], index: 8, kind: input, shape index: {}]   ;;  %s2970_s9 = inlined_call_operand.vmem [shape: f32[1,64], index: 9, kind: input, shape index: {}]   ;;  %s2971_s10 = inlined_call_operand.vmem [shape: f32[64,32], index: 10, kind: input, shape index: {}]   ;;  %s2972_s11 = inlined_call_operand.vmem [shape: f32[1,32], index: 11, kind: input, shape index: {}]   ;;  %s2973_s12 = inlined_call_operand.vmem [shape: f32[1,32], index: 12, kind: input, shape index: {}]   ;;  %s2974_s13 = inlined_call_operand.vmem [shape: f32[1,32], index: 13, kind: input, shape index: {}]   ;;  %s2975_s14 = inlined_call_operand.hbm [shape: f32[2,8,32], index: 14, kind: output, shape index: {}]  }
   0x1   :  { %2983 = sst [smem:[#allocation18_spill]] %s2961_s0 }
   0x2   :  { %2984 = sst [smem:[#allocation19_spill]] %s2968_s7 }
   0x3   :  { %2985 = sst [smem:[#allocation20_spill]] %s2970_s9 }
   0x4   :  { %2986 = sst [smem:[#allocation21_spill]] %s2972_s11 }
   0x5   :  { %2987 = sst [smem:[#allocation22_spill]] %s2973_s12 }
   0x6   :  { %2988 = sst [smem:[#allocation23_spill]] %s2974_s13 }
   0x7   :  { %2989 = sst [smem:[#allocation24_spill]] %s2975_s14 }
   0x8   :  { %19 = vsyncpa [#allocation6], 0 }
   0x9   :  { %21 = vsyncpa [#allocation6 + $0x1], 0 }
   0xa   :  { %22 = vsyncpa [#allocation9], 0 }
   0xb   :  { %23 = vsyncpa [#allocation7], 0 }
   0xc   :  { %25 = vsyncpa [#allocation7 + $0x1], 0  ;;  %s2525_s29 = smov 0   ;;  %s2527_s30 = smov 0  }
   0xd   :  { %s2529_s15 = smov 0   ;;  %s2531_s16 = smov 0  }
   0xe   :  { %s2533_s17 = smov 0   ;;  %s2535_s18 = smov 0  }
   0xf LB: > { %2990 = sst [smem:[#allocation15_spill]] %s2413_s29  ;;  %s1895_s19 = sadd.s32 4294967295, %s2433_s18   ;;  %s2433_s18 = sphi %s2535_s18, %s31_s18   ;;  %s2429_s17 = sphi %s2533_s17, %s3020_s17   ;;  %s2425_s16 = sphi %s2531_s16, %s3019_s16   ;;  %s2421_s15 = sphi %s2529_s15, %s3018_s15   ;;  %s2417_s30 = sphi %s2527_s30, %s3017_s30   ;;  %s2413_s29 = sphi %s2525_s29, %s3016_s29  }
  0x10   : > { %2991 = sst [smem:[#allocation16_spill]] %s2425_s16  ;;  %s1896_s20 = sadd.s32 4294967294, %s2433_s18  }
  0x11   : > { %p63_p0 = scmp.ne.s32.totalorder %s2417_s30, %s2413_s29  ;;  %p2559_p1 = scmp.eq.s32.totalorder %s1895_s19, 0 }
  0x12   : > { %p2563_p2 = scmp.eq.s32.totalorder %s1895_s19, 1  ;;  %p368_p3 = scmp.eq.s32.totalorder %s1896_s20, 1 }
  0x13   : > { %s2992_s21 = scalar_select %p2559_p1, 1, 0 }
  0x14   : > { %p2569_p4 = por %p2559_p1, %p63_p0  ;;  %p1897_p5 = scmp.ge.s32.totalorder %s2433_s18, 1 }
  0x15   : > { %p2574_p6 = por %p368_p3, %p63_p0  ;;  %p375_p7 = scmp.lt.s32.totalorder %s2433_s18, 3 }
  0x16   : > { %s2994_s23 = scalar_select %p2569_p4, 1, 0 }
  0x17   : > { %s2995_s24 = scalar_select %p2574_p6, 1, 0 }
  0x18   : > { %p2579_p8 = pnand %p1897_p5, %p375_p7  ;;  %s2435_s26 = smov [#allocation8]  }
  0x19   : > { %2996 = sst [smem:[#allocation17_spill]] %s2995_s24  ;;  %s396_s27 = sshll.u32 %s2435_s26, 4  ;;  %s2583_s27 = int_to_ptr.vmem [resolvable:$true] %s396_s27 }
  0x1a   : > { %p2155_p9 = pneg %p2579_p8  ;;  %s2436_s19 = smov [#allocation10]  }
  0x1b   : > { %s418_s20 = sshll.u32 %s2436_s19, 4  ;;  %s2261_s26 = scalar_lea.hbm %s2965_s4, 512  ;;  %s2594_s20 = int_to_ptr.vmem [resolvable:$true] %s418_s20 }
  0x1c   : > { %p2590_p11 = pnand %p2155_p9, %p2559_p1  ;;  %p2262_p12 = scmp.ne.s32.totalorder %s2965_s4, %s2261_s26 }
  0x1d   : > { %p2268_p5 = scmp.lt.u32.totalorder %s2261_s26, %s2965_s4 }
  0x1e   : > { %p2263_p13 = pneg %p2590_p11 }
  0x20   : > { %p2264_p0 = pnand %p2263_p13, %p2262_p12 }
  0x22   : > { %p2265_p3 = pneg %p2264_p0 }
  0x24   : > { %p2270_p7 = pnand %p2268_p5, %p2265_p3 }
  0x26   : > { %2273 = shalt.err (!%p2270_p7)
}
  0x27   : > { %s2274_s29 = scalar_lea.vmem %s2583_s27, 512  ;;  %p2282_p1 = scmp.lt.s32.totalorder %s2583_s27, %s2583_s27 }
  0x28   : > { %p2275_p9 = scmp.ne.s32.totalorder %s2583_s27, %s2274_s29  ;;  %p2283_p12 = scmp.lt.s32.totalorder %s2274_s29, %s2274_s29 }
  0x2a   : > { %p2277_p10 = pnand %p2275_p9, %p2263_p13  ;;  %p2284_p0 = por %p2283_p12, %p2282_p1 }
  0x2c   : > { %p2278_p6 = pneg %p2277_p10 }
  0x2e   : > { %p2285_p4 = pnand %p2284_p0, %p2278_p6 }
  0x30   : > { %2288 = shalt.err (!%p2285_p4)
}
  0x31   : > { %s2437_s12 = smov 128   ;;  %s2438_s13 = smov 8  }
  0x32   : > { %2158 = dma.hbm_to_vmem [thread:$0]  (!%p2590_p11), %s2965_s4, 512, %s2583_s27, [#allocation9], %s2437_s12, %s2437_s12, %s2438_s13  }
  0x33   : > { %s2289_s26 = scalar_lea.hbm %s2969_s8, 512 }
  0x34   : > { %p2290_p1 = scmp.ne.s32.totalorder %s2969_s8, %s2289_s26  ;;  %p2296_p10 = scmp.lt.u32.totalorder %s2289_s26, %s2969_s8 }
  0x36   : > { %p2292_p4 = pnand %p2290_p1, %p2263_p13 }
  0x38   : > { %p2293_p6 = pneg %p2292_p4 }
  0x3a   : > { %p2298_p3 = pnand %p2296_p10, %p2293_p6 }
  0x3c   : > { %2301 = shalt.err (!%p2298_p3)
}
  0x3d   : > { %s2302_s27 = scalar_lea.vmem %s2594_s20, 512  ;;  %p2310_p12 = scmp.lt.s32.totalorder %s2594_s20, %s2594_s20 }
  0x3e   : > { %p2303_p5 = scmp.ne.s32.totalorder %s2594_s20, %s2302_s27  ;;  %p2311_p0 = scmp.lt.s32.totalorder %s2302_s27, %s2302_s27 }
  0x40   : > { %p2305_p7 = pnand %p2303_p5, %p2263_p13  ;;  %p2312_p1 = por %p2311_p0, %p2310_p12 }
  0x42   : > { %p2306_p9 = pneg %p2305_p7 }
  0x44   : > { %p2313_p4 = pnand %p2312_p1, %p2306_p9 }
  0x46   : > { %2316 = shalt.err (!%p2313_p4)
}
  0x47   : > { %2161 = dma.hbm_to_vmem [thread:$0]  (!%p2590_p11), %s2969_s8, 512, %s2594_s20, [#allocation9], %s2437_s12, %s2437_s12, %s2438_s13  }
  0x48   : > { %s43_s11 = sadd.s32 1, %s2429_s17  ;;  %s50_s14 = sadd.s32 1, %s2421_s15 }
  0x49   : > { %p45_p13 = scmp.ge.s32.totalorder %s43_s11, 2  ;;  %p57_p6 = scmp.ne.s32.totalorder %s2421_s15, %s2417_s30 }
  0x4a   : > { %p58_p10 = scmp.eq.s32.totalorder %s2433_s18, 0  ;;  %p2172_p3 = scmp.lt.s32.totalorder %s2433_s18, 2 }
  0x4b   : > { %s3022_s11 = smov (%p45_p13, %s43_s11), 0  ;;  %p2658_p7 = por %p2563_p2, %p57_p6 }
  0x4c   : > { %p59_p5 = por %p58_p10, %p57_p6  ;;  %s47_s16 = ssub.s32 %s2429_s17, %s3022_s11 }
  0x4d   : > { %s2999_s28 = scalar_select %p2658_p7, 1, 0 }
  0x4e   : > { %s447_s24 = sand.u32 1, %s2421_s15   ;;  %p48_p9 = scmp.eq.s32.totalorder %s47_s16, 0 }
  0x4f   : > { %s1901_s20 = sshll.u32 %s447_s24, 3  ;;  %s1902_s12 = sshll.u32 %s2429_s17, 7 }
  0x50   : > { %s2667_s13 = scalar_select %p48_p9, %s2421_s15, %s50_s14  }
  0x51   : > { %s3000_s0 = sld [smem:[#allocation18_spill]]  ;;  %s451_s22 = scalar_lea.vmem [#allocation5], %s1901_s20 }
  0x52   : > { %s458_s27 = sshll.u32 %s451_s22, 4  ;;  %p2676_p2 = pnand %p2172_p3, %p59_p5  ;;  %s2680_s27 = int_to_ptr.vmem [resolvable:$true] %s458_s27 }
  0x53   : > { %s448_s9 = scalar_lea.sflag [#allocation6], %s447_s24 }
  0x54   : > { %p2319_p12 = pneg %p2676_p2 }
  0x57   : > { %s2672_s29 = scalar_lea.hbm %s3000_s0, %s1902_s12  ;;  %s2322_s12 = scalar_lea.hbm %s3000_s0, 256 }
  0x58   : > { %s2317_s14 = scalar_lea.hbm %s2672_s29, 128  ;;  %p2323_p4 = scmp.lt.u32.totalorder %s2672_s29, %s3000_s0 }
  0x59   : > { %p2318_p11 = scmp.ne.s32.totalorder %s2672_s29, %s2317_s14  ;;  %p2324_p13 = scmp.lt.u32.totalorder %s2322_s12, %s2317_s14 }
  0x5a   : > { %p2326_p10 = scmp.lt.u32.totalorder %s2317_s14, %s2672_s29 }
  0x5b   : > { %p2320_p0 = pnand %p2319_p12, %p2318_p11  ;;  %p2325_p6 = por %p2324_p13, %p2323_p4 }
  0x5d   : > { %p2321_p1 = pneg %p2320_p0  ;;  %p2327_p3 = por %p2326_p10, %p2325_p6 }
  0x5f   : > { %p2328_p5 = pnand %p2327_p3, %p2321_p1 }
  0x61   : > { %2331 = shalt.err (!%p2328_p5)
}
  0x62   : > { %s2332_s24 = scalar_lea.vmem %s2680_s27, 128  ;;  %s2439_s22 = smov [#allocation5]  }
  0x63   : > { %p2333_p9 = scmp.ne.s32.totalorder %s2680_s27, %s2332_s24  ;;  %s2337_s16 = sshll.u32 %s2439_s22, 4  ;;  %s2338_s16 = int_to_ptr.vmem [resolvable:$false] %s2337_s16 }
  0x64   : > { %s2339_s20 = scalar_lea.vmem %s2338_s16, 256  ;;  %p2340_p7 = scmp.lt.s32.totalorder %s2680_s27, %s2338_s16 }
  0x65   : > { %p2335_p11 = pnand %p2333_p9, %p2319_p12  ;;  %p2341_p4 = scmp.lt.s32.totalorder %s2339_s20, %s2332_s24 }
  0x67   : > { %p2336_p0 = pneg %p2335_p11  ;;  %p2342_p13 = por %p2341_p4, %p2340_p7 }
  0x69   : > { %p2343_p6 = pnand %p2342_p13, %p2336_p0 }
  0x6b   : > { %2346 = shalt.err (!%p2343_p6)
}
  0x6c   : > { %2165 = dma.hbm_to_vmem [thread:$0]  (!%p2676_p2), %s2672_s29, 128, %s2680_s27, %s448_s9  }
  0x6d   : > { %467 = sbr.rel (%p2579_p8) target bundleno = 2654 (0xa5e), region = 76  ;;  %s2710_s14 = sand.u32 (!%p2579_p8), 1, %s2417_s30  }
  0x6e   : > { %s1904_s12 = sshll.u32 (!%p2579_p8), %s2710_s14, 3  ;;  %s470_s19 = scalar_lea.sflag (!%p2579_p8), [#allocation6], %s2710_s14 }
  0x6f   : > { %s2716_s26 = scalar_lea.vmem (!%p2579_p8), [#allocation5], %s1904_s12  ;;  %p3002_p7 = scmp.ne.s32.totalorder (!%p2579_p8), %s2994_s23, 0 }
  0x74   : > { %2400 = dma.done.wait (%p3002_p7), %s470_s19, 128  }
  0x75   : > { %2402 = vsyncadd (%p3002_p7), %s470_s19, 4294967168  ;;  %p3003_p2 = scmp.ne.s32.totalorder %s2992_s21, 0 }
  0x77   : > { %2404 = dma.done.wait (%p3003_p2), [#allocation9], 1024  }
  0x78   : > { %2406 = vsyncadd (%p3003_p2), [#allocation9], 4294966272  ;;  %v2440_v0 = vmov 0.0|0.0   ;;  %vm2441_vm0 = vmmov 0   ;;  %v2442_v1 = vmov 0.0   ;;  %v531_v2 = vld [vmem:[%s2963_s2] sm:$0xff] }
  0x79   : > { %2101 = vmatprep.subr.bf16.mxu1 %v2440_v0  ;;  %1995 = vmatprep.mubr.msk.f32.mxu1 %vm2441_vm0, %v2442_v1  ;;  %v532_v3 = vld [vmem:[%s2963_s2 + $0x8] sm:$0xff]  ;;  %v533_v4 = vld [vmem:[%s2963_s2 + $0x10] sm:$0xff]  ;;  %v534_v6 = vld [vmem:[%s2963_s2 + $0x18] sm:$0xff]  ;;  %vm535_vm1 = vcmask 261120   ;;  %vm769_vm2 = vcmask 64512   ;;  %s2443_s19 = smov 112  }
  0x7a   : > { %2113 = vmatprep.subr.bf16.mxu0 %v2440_v0  ;;  %2017 = vmatprep.mubr.msk.f32.mxu0 %vm2441_vm0, %v2442_v1  ;;  %v2102_v5 = vpack.c.bf16 %v532_v3, %v531_v2  ;;  %v688_v7 = vld [vmem:[%s2962_s1] sm:$0xff]  ;;  %v689_v8 = vld [vmem:[%s2962_s1 + $0x8] sm:$0xff]  ;;  %v690_v9 = vld [vmem:[%s2962_s1 + $0x10] sm:$0xff]  ;;  %v2105_v11 = vpack.c.bf16 %v534_v6, %v533_v4  ;;  %s2444_s23 = smov 120   ;;  %s2445_s25 = smov 104   ;;  %vm1101_vm3 = vcmask 130112  }
  0x7b   : > { %v691_v10 = vld [vmem:[%s2962_s1 + $0x18] sm:$0xff]  ;;  %v2114_v12 = vpack.c.bf16 %v689_v8, %v688_v7  ;;  %v610_v13 = vld [vmem:[%s2964_s3] sm:$0xff]  ;;  %v611_v14 = vld [vmem:[%s2964_s3 + $0x8] sm:$0xff]  ;;  %s2446_s29 = smov 8   ;;  %s2447_s21 = smov 16   ;;  %vm1272_vm4 = vcmask 195712  }
  0x7c   : > { %2103 = vmatpush3.bf16.msra.mxu1 %v2102_v5  ;;  %v2117_v15 = vpack.c.bf16 %v691_v10, %v690_v9  ;;  %v2765_v16 = vld [vmem:[%s2716_s26] sm:$0xff]  ;;  %v2108_v17 = vpack.c.bf16 %v611_v14, %v610_v13  ;;  %v612_v18 = vld [vmem:[%s2964_s3 + $0x10] sm:$0xff]  ;;  %s2448_s27 = smov 24   ;;  %vm1443_vm5 = vcmask 261312   ;;  %s3004_s16 = sld [smem:[#allocation19_spill]]  ;;  %vm1668_vm8 = vcmask 523264  }
  0x7d   : > { %2104 = vmatprep.subr.bf16.mxu1 %v2440_v0  ;;  %2115 = vmatpush3.bf16.msra.mxu0 %v2114_v12  ;;  %v613_v19 = vld [vmem:[%s2964_s3 + $0x18] sm:$0xff]  ;;  %s3006_s24 = sld [smem:[#allocation21_spill]]  ;;  %s3007_s26 = sld [smem:[#allocation16_spill]] }
  0x7e   : > { %2116 = vmatprep.subr.bf16.mxu0 %v2440_v0  ;;  %v2111_v20 = vpack.c.bf16 %v613_v19, %v612_v18  ;;  %s3008_s20 = sld [smem:[#allocation22_spill]]  ;;  %s1781_s22 = scalar_lea.sflag [#allocation7], %s2710_s14 }
  0x7f   : > { %p3011_p12 = scmp.ne.s32.totalorder %s2999_s28, 0 }
  0x80   : > { %2106 = vmatpush3.bf16.msra.mxu1 %v2105_v11 }
  0x81   : > { %2107 = vmatprep.subr.bf16.mxu1 %v2440_v0  ;;  %2118 = vmatpush3.bf16.msra.mxu0 %v2117_v15 }
  0x82   : > { %2030 = vmatprep.subr.mxu0 %v2442_v1 }
  0x83   : > { %1996 = vmatmul.mubr.msk.f32.vlgmr.msra.gmra.mrb[0].mxu1 %vm535_vm1, %v2765_v16 }
  0x84   : > { %2109 = vmatpush3.bf16.msra.mxu1 %v2108_v17  ;;  %2006 = vmatprep.mubr.msk.f32.mxu1 %vm2441_vm0, %v2442_v1 }
  0x85   : > { %2018 = vmatmul.mubr.msk.f32.vlgmr.msra.gmra.mrb[0].mxu0 %vm535_vm1, %v2765_v16  ;;  %2110 = vmatprep.subr.bf16.mxu1 %v2440_v0 }
  0x86   : > { %2032 = vmatprep.mubr.msk.f32.mxu0 %vm2441_vm0, %v2442_v1 }
  0x88   : > { %2112 = vmatpush3.bf16.msra.mxu1 %v2111_v20 }
  0x89   : > { %2020 = vmatprep.subr.mxu1 %v2442_v1 }
  0x8b   : > { %2007 = vmatmul.mubr.msk.f32.vlgmr.msra.gmra.mrb[2].mxu1 %vm535_vm1, %v2765_v16 }
  0x8c   : > { %2022 = vmatprep.mubr.msk.f32.mxu1 %vm2441_vm0, %v2442_v1 }
 0x156   : > { %v605_v21 = vpop.f32.mrb[0].mxu1 }
 0x157   : > { %609 = vst.msk [vmem:[#allocation2] sm:$0xff] %vm535_vm1, %v605_v21  ;;  %v1997_v22 = vpop.f32.mrb[1].mxu1 }
 0x158   : > { %v762_v23 = vpop.f32.mrb[0].mxu0 }
 0x159   : > { %v2019_v24 = vpop.f32.mrb[1].mxu0  ;;  %v766_v26 = vmul.f32 0.35355338, %v762_v23 }
 0x15a   : > { %v1446_v24 = vld [vmem:[#allocation8] sm:$0xff] }
 0x15e   : > { %v767_v25 = vld [vmem:[#allocation2] sm:$0xff]  ;;  %v680_v27 = vpop.f32.mrb[2].mxu1 }
 0x15f   : > { %1105 = vrot.lane.b32.xlu1 %v767_v25, %s2443_s19  ;;  %933 = vrot.lane.b32.xlu0 %v767_v25, %s2444_s23  ;;  %684 = vst.msk [vmem:[#allocation3] sm:$0xff] %vm535_vm1, %v680_v27  ;;  %v2008_v28 = vpop.f32.mrb[3].mxu1  ;;  %v1448_v27 = vld [vmem:[#allocation8 + $0x10] sm:$0xff] }
 0x160   : > { %2021 = vmatpush3.xpose.msk.msra.mxu1 %vm769_vm2, %v767_v25  ;;  %v1449_v28 = vld [vmem:[#allocation8 + $0x18] sm:$0xff] }
 0x161   : > { %2025 = vmatprep.subr.mxu1 %v2442_v1 }
 0x163   : > { %2023 = vmatmul.mubr.msk.f32.vlgmr.msra.gmra.mrb[4].mxu1 %vm769_vm2, %v766_v26  ;;  %1103 = vrot.lane.b32.xlu1 %v766_v26, %s2443_s19 }
 0x164   : > { %931 = vrot.lane.b32.xlu0 %v766_v26, %s2444_s23  ;;  %2027 = vmatprep.mubr.msk.f32.mxu1 %vm2441_vm0, %v2442_v1 }
 0x166   : > { %v768_v35 = vld [vmem:[#allocation3] sm:$0xff] }
 0x167   : > { %1274 = vrot.lane.b32.xlu1 %v766_v26, %s2445_s25  ;;  %2026 = vmatpush3.msra.mxu1 %v768_v35 }
 0x168   : > { %1276 = vrot.lane.b32.xlu0 %v767_v25, %s2445_s25  ;;  %2035 = vmatprep.subr.mxu1 %v2442_v1  ;;  %v1447_v25 = vld [vmem:[#allocation8 + $0x8] sm:$0xff] }
 0x169   : > { %v2120_v26 = vpack.c.bf16 %v1447_v25, %v1446_v24  ;;  %v1929_v24 = vld [vmem:[%s3006_s24] ss:$0 sm:$0xff]  ;;  %s3010_s24 = sld [smem:[#allocation24_spill]] }
 0x1d1   : > { %v934_v29 = vpop.permute.xlu0 %933  ;;  %v1106_v30 = vpop.permute.xlu1 %1105 }
 0x1d2   : > { %2031 = vmatpush3.xpose.msk.msra.mxu0 %vm769_vm2, %v934_v29  ;;  %v2123_v29 = vpack.c.bf16 %v1449_v28, %v1448_v27 }
 0x1d3   : > { %2040 = vmatprep.subr.mxu0 %v2442_v1 }
 0x1d5   : > { %v1104_v32 = vpop.permute.xlu1 %1103 }
 0x1d6   : > { %v932_v31 = vpop.permute.xlu0 %931 }
 0x1d7   : > { %2033 = vmatmul.mubr.msk.f32.vlgmr.msra.gmra.mrb[2].mxu0 %vm769_vm2, %v932_v31 }
 0x1d8   : > { %2041 = vmatpush3.xpose.msk.msra.mxu0 %vm769_vm2, %v1106_v30  ;;  %2042 = vmatprep.mubr.msk.f32.mxu0 %vm2441_vm0, %v2442_v1 }
 0x1d9   : > { %2050 = vmatprep.subr.mxu0 %v2442_v1  ;;  %v1275_v34 = vpop.permute.xlu1 %1274 }
 0x1da   : > { %v1277_v33 = vpop.permute.xlu0 %1276 }
 0x1db   : > { %2043 = vmatmul.mubr.msk.f32.vlgmr.msra.gmra.mrb[4].mxu0 %vm769_vm2, %v1104_v32 }
 0x1dc   : > { %2051 = vmatpush3.xpose.msk.msra.mxu0 %vm769_vm2, %v1277_v33  ;;  %2052 = vmatprep.mubr.msk.f32.mxu0 %vm2441_vm0, %v2442_v1 }
 0x1dd   : > { %2119 = vmatprep.subr.bf16.mxu0 %v2440_v0 }
 0x1df   : > { %2053 = vmatmul.mubr.msk.f32.vlgmr.msra.gmra.mrb[6].mxu0 %vm769_vm2, %v1275_v34 }
 0x1e0   : > { %2068 = vmatprep.mubr.msk.f32.mxu0 %vm2441_vm0, %v2442_v1  ;;  %2121 = vmatpush3.bf16.msra.mxu0 %v2120_v26 }
 0x1e1   : > { %2122 = vmatprep.subr.bf16.mxu0 %v2440_v0 }
 0x1e4   : > { %2124 = vmatpush3.bf16.msra.mxu0 %v2123_v29 }
 0x1e5   : > { %2131 = vmatprep.subr.bf16.mxu0 %v2440_v0 }
 0x236   : > { %v842_v36 = vpop.f32.mrb[4].mxu1 }
 0x237   : > { %v2024_v37 = vpop.f32.mrb[5].mxu1  ;;  %v846_v38 = vsel %vm769_vm2, %v842_v36, -inf }
 0x238   : > { %847 = vmax.xlane.f32.xlu0 %v846_v38 }
 0x2aa   : > { %v1005_v39 = vpop.f32.mrb[2].mxu0 }
 0x2ab   : > { %v2034_v40 = vpop.f32.mrb[3].mxu0  ;;  %v1009_v41 = vsel %vm769_vm2, %v1005_v39, -inf }
 0x2ac   : > { %1010 = vmax.xlane.f32.xlu1 %v1009_v41  ;;  %v1923_v40 = vld [vmem:[%s2966_s5] ss:$0 sm:$0xff] }
 0x2ae   : > { %v1177_v42 = vpop.f32.mrb[4].mxu0 }
 0x2af   : > { %v2044_v43 = vpop.f32.mrb[5].mxu0  ;;  %v1181_v44 = vsel %vm769_vm2, %v1177_v42, -inf }
 0x2b0   : > { %1182 = vmax.xlane.f32.xlu0 %v1181_v44 }
 0x2b2   : > { %v1348_v45 = vpop.f32.mrb[6].mxu0 }
 0x2b3   : > { %v2054_v46 = vpop.f32.mrb[7].mxu0  ;;  %v1352_v47 = vsel %vm769_vm2, %v1348_v45, -inf }
 0x2b4   : > { %1353 = vmax.xlane.f32.xlu0 %v1352_v47 }
 0x2bd   : > { %1021 = vrot.lane.b32.xlu1 %v768_v35, %s2444_s23 }
 0x2c5   : > { %v848_v48 = vpop.xlane.xlu0 %847 }
 0x2c6   : > { %v849_v49 = vsub.f32 %v842_v36, %v848_v48 }
 0x2c8   : > { %v850_v50 = vmul.f32 1.442695, %v849_v49 }
 0x2ca   : > { %2237 = vpow2.f32 %v850_v50 }
 0x2d4   : > { %v2238_v51 = vpop.eup %2237 }
 0x2d5   : > { %v852_v52 = vsel %vm769_vm2, %v2238_v51, 0.0 }
 0x2e1   : > { %853 = vadd.xlane.f32.xlu1 %v852_v52  ;;  %v1570_v52 = vld [vmem:[#allocation10 + $0x10] sm:$0xff] }
 0x339   : > { %v1011_v53 = vpop.xlane.xlu1 %1010 }
 0x33a   : > { %v1012_v54 = vsub.f32 %v1005_v39, %v1011_v53 }
 0x33c   : > { %v1013_v55 = vmul.f32 1.442695, %v1012_v54  ;;  %v1571_v54 = vld [vmem:[#allocation10 + $0x18] sm:$0xff] }
 0x33d   : > { %v1183_v56 = vpop.xlane.xlu0 %1182  ;;  %v1022_v6 = vpop.permute.xlu1 %1021 }
 0x33e   : > { %2239 = vpow2.f32 %v1013_v55  ;;  %v1184_v57 = vsub.f32 %v1177_v42, %v1183_v56  ;;  %v2129_v55 = vpack.c.bf16 %v1571_v54, %v1570_v52  ;;  %v1654_v56 = vld [vmem:[%s2971_s10 + $0x8] sm:$0xff] }
 0x340   : > { %v1185_v58 = vmul.f32 1.442695, %v1184_v57  ;;  %v1655_v57 = vld [vmem:[%s2971_s10 + $0x10] sm:$0xff] }
 0x341   : > { %v1354_v59 = vpop.xlane.xlu0 %1353 }
 0x342   : > { %2241 = vpow2.f32 %v1185_v58  ;;  %v1355_v60 = vsub.f32 %v1348_v45, %v1354_v59  ;;  %v1656_v59 = vld [vmem:[%s2971_s10 + $0x18] sm:$0xff] }
 0x344   : > { %v1356_v61 = vmul.f32 1.442695, %v1355_v60  ;;  %v2135_v60 = vpack.c.bf16 %v1656_v59, %v1655_v57 }
 0x346   : > { %2243 = vpow2.f32 %v1356_v61  ;;  %v1657_v61 = vld [vmem:[%s2971_s10 + $0x20] sm:$0xff] }
 0x348   : > { %v2240_v62 = vpop.eup %2239 }
 0x349   : > { %v1015_v63 = vsel %vm769_vm2, %v2240_v62, 0.0 }
 0x34a   : > { %1016 = vadd.xlane.f32.xlu0 %v1015_v63 }
 0x34c   : > { %v2242_v2 = vpop.eup %2241 }
 0x34d   : > { %v1187_v3 = vsel %vm769_vm2, %v2242_v2, 0.0 }
 0x34e   : > { %1188 = vadd.xlane.f32.xlu1 %v1187_v3 }
 0x350   : > { %v2244_v4 = vpop.eup %2243 }
 0x351   : > { %v1358_v5 = vsel %vm769_vm2, %v2244_v4, 0.0 }
 0x352   : > { %1359 = vadd.xlane.f32.xlu0 %v1358_v5 }
 0x35f   : > { %1363 = vrot.lane.b32.xlu1 %v768_v35, %s2445_s25  ;;  %s3009_s25 = sld [smem:[#allocation23_spill]] }
 0x368   : > { %1192 = vrot.lane.b32.xlu0 %v768_v35, %s2443_s19 }
 0x36e   : > { %v854_v7 = vpop.xlane.xlu1 %853 }
 0x36f   : > { %2245 = vrcp.f32 %v854_v7 }
 0x379   : > { %v2246_v8 = vpop.eup %2245 }
 0x37a   : > { %v856_v9 = vmul.f32 %v2246_v8, %v2238_v51  ;;  %v1569_v51 = vld [vmem:[#allocation10 + $0x8] sm:$0xff] }
 0x37c   : > { %2028 = vmatmul.mubr.msk.f32.vlgmr.msra.gmra.mrb[6].mxu1 %vm769_vm2, %v856_v9 }
 0x37d   : > { %2036 = vmatpush3.msra.mxu1 %v1022_v6  ;;  %2037 = vmatprep.mubr.msk.f32.mxu1 %vm2441_vm0, %v2442_v1 }
 0x37e   : > { %2045 = vmatprep.subr.mxu1 %v2442_v1 }
 0x3d7   : > { %v1017_v10 = vpop.xlane.xlu0 %1016 }
 0x3d8   : > { %2247 = vrcp.f32 %v1017_v10  ;;  %v1925_v10 = vld [vmem:[%s2967_s6] ss:$0 sm:$0xff] }
 0x3db   : > { %v1189_v11 = vpop.xlane.xlu1 %1188 }
 0x3dc   : > { %2249 = vrcp.f32 %v1189_v11 }
 0x3df   : > { %v1360_v12 = vpop.xlane.xlu0 %1359  ;;  %v1364_v19 = vpop.permute.xlu1 %1363 }
 0x3e0   : > { %2251 = vrcp.f32 %v1360_v12 }
 0x3e2   : > { %v2248_v13 = vpop.eup %2247 }
 0x3e3   : > { %v1019_v14 = vmul.f32 %v2248_v13, %v2240_v62  ;;  %v1193_v15 = vpop.permute.xlu0 %1192  ;;  %v1658_v62 = vld [vmem:[%s2971_s10 + $0x28] sm:$0xff] }
 0x3e4   : > { %v2138_v63 = vpack.c.bf16 %v1658_v62, %v1657_v61 }
 0x3e5   : > { %2038 = vmatmul.mubr.msk.f32.vlgmr.msra.gmra.mrb[8].mxu1 %vm769_vm2, %v1019_v14 }
 0x3e6   : > { %v2250_v17 = vpop.eup %2249  ;;  %2046 = vmatpush3.msra.mxu1 %v1193_v15  ;;  %2047 = vmatprep.mubr.msk.f32.mxu1 %vm2441_vm0, %v2442_v1  ;;  %v1659_v15 = vld [vmem:[%s2971_s10 + $0x30] sm:$0xff] }
 0x3e7   : > { %v1191_v18 = vmul.f32 %v2250_v17, %v2242_v2  ;;  %2055 = vmatprep.subr.mxu1 %v2442_v1  ;;  %v1660_v17 = vld [vmem:[%s2971_s10 + $0x38] sm:$0xff] }
 0x3e9   : > { %2048 = vmatmul.mubr.msk.f32.vlgmr.msra.gmra.mrb[10].mxu1 %vm769_vm2, %v1191_v18  ;;  %v2141_v18 = vpack.c.bf16 %v1660_v17, %v1659_v15 }
 0x3ea   : > { %v2252_v20 = vpop.eup %2251  ;;  %2056 = vmatpush3.msra.mxu1 %v1364_v19  ;;  %2057 = vmatprep.mubr.msk.f32.mxu1 %vm2441_vm0, %v2442_v1 }
 0x3eb   : > { %v1362_v21 = vmul.f32 %v2252_v20, %v2244_v4  ;;  %2125 = vmatprep.subr.bf16.mxu1 %v2440_v0 }
 0x3ed   : > { %2058 = vmatmul.mubr.msk.f32.vlgmr.msra.gmra.mrb[12].mxu1 %vm769_vm2, %v1362_v21 }
 0x3ee   : > { %2079 = vmatprep.mubr.msk.f32.mxu1 %vm2441_vm0, %v2442_v1 }
 0x44f   : > { %v926_v22 = vpop.f32.mrb[6].mxu1 }
 0x450   : > { %930 = vst.msk [vmem:[#allocation4] sm:$0xff] %vm769_vm2, %v926_v22  ;;  %v2029_v23 = vpop.f32.mrb[7].mxu1 }
 0x4b8   : > { %v1093_v30 = vpop.f32.mrb[8].mxu1 }
 0x4b9   : > { %1098 = vrot.lane.b32.xlu1 %v1093_v30, %s2446_s29  ;;  %v2039_v31 = vpop.f32.mrb[9].mxu1  ;;  %s1934_s29 = sshll.u32 %s3007_s26, 7 }
 0x4ba   : > { %s2911_s0 = scalar_lea.hbm %s3010_s24, %s1934_s29 }
 0x4bc   : > { %v1264_v32 = vpop.f32.mrb[10].mxu1 }
 0x4bd   : > { %1269 = vrot.lane.b32.xlu0 %v1264_v32, %s2447_s21  ;;  %v2049_v33 = vpop.f32.mrb[11].mxu1  ;;  %s525_s21 = scalar_lea.vmem [#allocation11], %s1904_s12  ;;  %s2449_s12 = smov [#allocation11]  }
 0x4be   : > { %s2351_s26 = sshll.u32 %s2449_s12, 4  ;;  %s2352_s26 = int_to_ptr.vmem [resolvable:$false] %s2351_s26 }
 0x4c0   : > { %v1435_v34 = vpop.f32.mrb[12].mxu1 }
 0x4c1   : > { %1440 = vrot.lane.b32.xlu1 %v1435_v34, %s2448_s27  ;;  %v2059_v35 = vpop.f32.mrb[13].mxu1  ;;  %s3005_s27 = sld [smem:[#allocation20_spill]] }
 0x4c7   : > { %v1927_v19 = vld [vmem:[%s3005_s27] ss:$0 sm:$0xff]  ;;  %s1795_s27 = sshll.u32 %s525_s21, 4  ;;  %s2913_s27 = int_to_ptr.vmem [resolvable:$true] %s1795_s27 }
 0x4c8   : > { %p2354_p3 = scmp.lt.s32.totalorder %s2913_s27, %s2352_s26 }
 0x52b   : > { %v1099_v36 = vpop.permute.xlu1 %1098 }
 0x52c   : > { %1102 = vst.msk [vmem:[#allocation4] sm:$0xff] %vm1101_vm3, %v1099_v36 }
 0x52f   : > { %v1270_v37 = vpop.permute.xlu0 %1269 }
 0x530   : > { %1273 = vst.msk [vmem:[#allocation4] sm:$0xff] %vm1272_vm4, %v1270_v37 }
 0x533   : > { %v1441_v38 = vpop.permute.xlu1 %1440 }
 0x534   : > { %1444 = vst.msk [vmem:[#allocation4] sm:$0xff] %vm1443_vm5, %v1441_v38 }
 0x53b   : > { %v1445_v39 = vld [vmem:[#allocation4] sm:$0xff] }
 0x53c   : > { %2069 = vmatmul.mubr.msk.f32.vlgmr.msra.gmra.mrb[8].mxu0 %vm535_vm1, %v1445_v39 }
 0x53d   : > { %2098 = vmatprep.mubr.msk.f32.mxu0 %vm2441_vm0, %v2442_v1  ;;  %v1568_v1 = vld [vmem:[#allocation10] sm:$0xff] }
 0x53e   : > { %v2126_v53 = vpack.c.bf16 %v1569_v51, %v1568_v1 }
 0x540   : > { %2127 = vmatpush3.bf16.msra.mxu1 %v2126_v53 }
 0x541   : > { %2128 = vmatprep.subr.bf16.mxu1 %v2440_v0 }
 0x544   : > { %2130 = vmatpush3.bf16.msra.mxu1 %v2129_v55 }
 0x60f   : > { %v1526_v41 = vpop.f32.mrb[8].mxu0 }
 0x610   : > { %v1527_v42 = vadd.f32 %v1923_v40, %v1526_v41  ;;  %v2070_v43 = vpop.f32.mrb[9].mxu0 }
 0x611   : > { %v1931_v43 = vld [vmem:[%s3008_s20] ss:$0 sm:$0xff]  ;;  %s2353_s20 = scalar_lea.vmem %s2352_s26, 256 }
 0x612   : > { %v1530_v44 = vadd.f32 %v1527_v42, %v2765_v16  ;;  %v1653_v16 = vld [vmem:[%s2971_s10] sm:$0xff] }
 0x613   : > { %v2132_v58 = vpack.c.bf16 %v1654_v56, %v1653_v16 }
 0x614   : > { %v1533_v45 = vsel %vm535_vm1, %v1530_v44, 0.0 }
 0x615   : > { %1534 = vadd.xlane.f32.xlu0 %v1533_v45  ;;  %2133 = vmatpush3.bf16.msra.mxu0 %v2132_v58 }
 0x616   : > { %2134 = vmatprep.subr.bf16.mxu0 %v2440_v0 }
 0x619   : > { %2136 = vmatpush3.bf16.msra.mxu0 %v2135_v60 }
 0x61a   : > { %2137 = vmatprep.subr.bf16.mxu0 %v2440_v0 }
 0x61d   : > { %2139 = vmatpush3.bf16.msra.mxu0 %v2138_v63 }
 0x61e   : > { %2140 = vmatprep.subr.bf16.mxu0 %v2440_v0  ;;  %v1926_v0 = vld [vmem:[%s3004_s16] ss:$0 sm:$0xff]  ;;  %s2347_s16 = scalar_lea.vmem %s2913_s27, 128 }
 0x61f   : > { %p2348_p8 = scmp.ne.s32.totalorder %s2913_s27, %s2347_s16  ;;  %p2355_p5 = scmp.lt.s32.totalorder %s2353_s20, %s2347_s16 }
 0x621   : > { %2142 = vmatpush3.bf16.msra.mxu0 %v2141_v18  ;;  %p2349_p1 = pnand %p2348_p8, %p3011_p12  ;;  %p2356_p9 = por %p2355_p5, %p2354_p3 }
 0x623   : > { %p2350_p10 = pneg %p2349_p1 }
 0x625   : > { %p2357_p11 = pnand %p2356_p9, %p2350_p10 }
 0x6a2   : > { %v1535_v46 = vpop.xlane.xlu0 %1534 }
 0x6a3   : > { %v1537_v47 = vmul.f32 0.03125, %v1535_v46  ;;  %v1932_v46 = vld [vmem:[%s3009_s25] ss:$0 sm:$0xff] }
 0x6a5   : > { %v1538_v48 = vsub.f32 %v1530_v44, %v1537_v47 }
 0x6a7   : > { %v1539_v49 = vmul.f32 %v1538_v48, %v1538_v48  ;;  %v1557_v11 = vmul.f32 %v1925_v10, %v1538_v48 }
 0x6a9   : > { %v1540_v50 = vsel %vm535_vm1, %v1539_v49, 0.0 }
 0x6aa   : > { %1541 = vadd.xlane.f32.xlu1 %v1540_v50 }
 0x737   : > { %v1542_v2 = vpop.xlane.xlu1 %1541 }
 0x738   : > { %v1543_v3 = vmul.f32 0.032258064, %v1542_v2 }
 0x73a   : > { %2253 = vrsqrt.f32 %v1543_v3  ;;  %vm1546_vm6 = vcmp.eq.f32.partialorder %v1543_v3, inf  ;;  %v1549_v6 = vand.u32 2147483648, %v1543_v3  ;;  %vm1548_vm7 = vcmp.eq.f32.partialorder %v1543_v3, 0.0 }
 0x744   : > { %v2254_v4 = vpop.eup %2253 }
 0x745   : > { %v1545_v5 = vmul.f32 %v2254_v4, %v1543_v3 }
 0x747   : > { %v1547_v7 = vsel %vm1546_vm6, %v1543_v3, %v1545_v5 }
 0x748   : > { %v1550_v8 = vsel %vm1548_vm7, %v1549_v6, %v1547_v7 }
 0x749   : > { %v1558_v9 = vadd.f32 1e-06, %v1550_v8 }
 0x74b   : > { %2255 = vrcp.f32 %v1558_v9 }
 0x755   : > { %v2256_v12 = vpop.eup %2255 }
 0x756   : > { %v1560_v13 = vmul.f32 %v2256_v12, %v1557_v11 }
 0x758   : > { %v1567_v14 = vadd.f32 %v1926_v0, %v1560_v13 }
 0x75a   : > { %2080 = vmatmul.mubr.msk.f32.vlgmr.msra.gmra.mrb[14].mxu1 %vm535_vm1, %v1567_v14 }
 0x82d   : > { %v1648_v20 = vpop.f32.mrb[14].mxu1 }
 0x82e   : > { %v1649_v21 = vadd.f32 %v1927_v19, %v1648_v20  ;;  %v2081_v22 = vpop.f32.mrb[15].mxu1 }
 0x830   : > { %v1652_v23 = vmax.f32 %v1649_v21, 0.0 }
 0x832   : > { %2099 = vmatmul.mubr.msk.f32.vlgmr.msra.gmra.mrb[10].mxu0 %vm1668_vm8, %v1652_v23 }
 0x905   : > { %v1738_v25 = vpop.f32.mrb[10].mxu0 }
 0x906   : > { %v1739_v26 = vadd.f32 %v1929_v24, %v1738_v25  ;;  %v2100_v27 = vpop.f32.mrb[11].mxu0 }
 0x908   : > { %v1742_v28 = vadd.f32 %v1739_v26, %v1567_v14 }
 0x90a   : > { %v1745_v29 = vsel %vm535_vm1, %v1742_v28, 0.0 }
 0x90b   : > { %1746 = vadd.xlane.f32.xlu0 %v1745_v29 }
 0x998   : > { %v1747_v30 = vpop.xlane.xlu0 %1746 }
 0x999   : > { %v1748_v31 = vmul.f32 0.03125, %v1747_v30 }
 0x99b   : > { %v1749_v32 = vsub.f32 %v1742_v28, %v1748_v31 }
 0x99d   : > { %v1750_v33 = vmul.f32 %v1749_v32, %v1749_v32  ;;  %v1768_v44 = vmul.f32 %v1931_v43, %v1749_v32 }
 0x99f   : > { %v1751_v34 = vsel %vm535_vm1, %v1750_v33, 0.0 }
 0x9a0   : > { %1752 = vadd.xlane.f32.xlu0 %v1751_v34 }
 0xa2d   : > { %v1753_v35 = vpop.xlane.xlu0 %1752 }
 0xa2e   : > { %v1754_v36 = vmul.f32 0.032258064, %v1753_v35 }
 0xa30   : > { %2257 = vrsqrt.f32 %v1754_v36  ;;  %vm1757_vm9 = vcmp.eq.f32.partialorder %v1754_v36, inf  ;;  %v1760_v39 = vand.u32 2147483648, %v1754_v36  ;;  %vm1759_vm10 = vcmp.eq.f32.partialorder %v1754_v36, 0.0 }
 0xa3a   : > { %v2258_v37 = vpop.eup %2257 }
 0xa3b   : > { %v1756_v38 = vmul.f32 %v2258_v37, %v1754_v36 }
 0xa3d   : > { %v1758_v40 = vsel %vm1757_vm9, %v1754_v36, %v1756_v38 }
 0xa3e   : > { %v1761_v41 = vsel %vm1759_vm10, %v1760_v39, %v1758_v40 }
 0xa3f   : > { %v1769_v42 = vadd.f32 1e-06, %v1761_v41 }
 0xa41   : > { %2259 = vrcp.f32 %v1769_v42 }
 0xa4b   : > { %v2260_v45 = vpop.eup %2259 }
 0xa4c   : > { %v1771_v47 = vmul.f32 %v2260_v45, %v1768_v44 }
 0xa4e   : > { %v1778_v48 = vadd.f32 %v1932_v46, %v1771_v47 }
 0xa50   : > { %1779 = vst.msk [vmem:[%s525_s21] sm:$0xff] %vm535_vm1, %v1778_v48 }
 0xa51   : > { %2360 = shalt.err (!%p2357_p11)
}
 0xa52   : > { %s2361_s14 = scalar_lea.hbm %s2911_s0, 128  ;;  %s2365_s25 = scalar_lea.hbm %s3010_s24, 256 }
 0xa53   : > { %p2362_p0 = scmp.ne.s32.totalorder %s2911_s0, %s2361_s14  ;;  %p2366_p6 = scmp.lt.u32.totalorder %s2911_s0, %s3010_s24 }
 0xa54   : > { %p2367_p7 = scmp.lt.u32.totalorder %s2365_s25, %s2361_s14  ;;  %p2369_p8 = scmp.lt.u32.totalorder %s2361_s14, %s2911_s0 }
 0xa55   : > { %p2363_p4 = pnand %p2362_p0, %p3011_p12 }
 0xa56   : > { %p2368_p2 = por %p2367_p7, %p2366_p6 }
 0xa57   : > { %p2364_p13 = pneg %p2363_p4 }
 0xa58   : > { %p2370_p1 = por %p2369_p8, %p2368_p2 }
 0xa5a   : > { %p2371_p10 = pnand %p2370_p1, %p2364_p13 }
 0xa5c   : > { %2374 = shalt.err (!%p2371_p10)
}
 0xa5d   : > { %2153 = dma.vmem_to_hbm [thread:$0]  (%p3011_p12), %s2913_s27, 128, %s2911_s0, %s1781_s22  }
 0xa5e PF: > { %s3012_s7 = sld [smem:[#allocation15_spill]]  ;;  %s3013_s9 = sld [smem:[#allocation17_spill]] }
 0xa5f   : > { %p3015_p5 = scmp.ge.s32.totalorder %s2433_s18, 2 }
 0xa64   : > { %s1807_s16 = sand.u32 1, %s3012_s7   ;;  %p3014_p3 = scmp.ne.s32.totalorder %s3013_s9, 0 }
 0xa65   : > { %s1808_s12 = scalar_lea.sflag [#allocation7], %s1807_s16 }
 0xa66   : > { %p2167_p9 = pnand %p3015_p5, %p3014_p3 }
 0xa68   : > { %2408 = dma.done.wait (!%p2167_p9), %s1808_s12, 128  }
 0xa69   : > { %2410 = vsyncadd (!%p2167_p9), %s1808_s12, 4294967168  ;;  %s31_s18 = sadd.s32 1, %s2433_s18   ;;  %s3016_s29 = smov %s2417_s30 }
 0xa6a   : > { %p28_p11 = scmp.ge.s32.totalorder %s31_s18, 4   ;;  %s3017_s30 = smov %s2421_s15 }
 0xa6b   : > { %s3018_s15 = smov %s2667_s13  ;;  %s3019_s16 = smov %s2429_s17 }
 0xa6c   : > { %s3020_s17 = smov %s3022_s11  ;;  %30 = sbr.rel (!%p28_p11) target bundleno = 15 (0xf), region = 134 }
 0xa73   :  { %1813 = vsyncpa [#allocation6], 1 }
 0xa74   :  { %1815 = vsyncpa [#allocation6 + $0x1], 1 }
 0xa75   :  { %1816 = vsyncpa [#allocation9], 1 }
 0xa76   :  { %1817 = vsyncpa [#allocation7], 1 }
 0xa77   :  { %1819 = vsyncpa [#allocation7 + $0x1], 1 }

// kernel: tpu_custom_call.1
= control target key start
LH: loop header
LB: loop body
LE: loop exit
PB: predicated region body
PF: predicated region fallthrough
CT: control target
= control target key end

     0   :  { %s2961_s0 = inlined_call_operand.hbm [shape: f32[2,8,32], index: 0, kind: input, shape index: {}]   ;;  %s2962_s1 = inlined_call_operand.vmem [shape: f32[32,32], index: 1, kind: input, shape index: {}]   ;;  %s2963_s2 = inlined_call_operand.vmem [shape: f32[32,32], index: 2, kind: input, shape index: {}]   ;;  %s2964_s3 = inlined_call_operand.vmem [shape: f32[32,32], index: 3, kind: input, shape index: {}]   ;;  %s2965_s4 = inlined_call_operand.hbm [shape: f32[32,32], index: 4, kind: input, shape index: {}]   ;;  %s2966_s5 = inlined_call_operand.vmem [shape: f32[1,32], index: 5, kind: input, shape index: {}]   ;;  %s2967_s6 = inlined_call_operand.vmem [shape: f32[1,32], index: 6, kind: input, shape index: {}]   ;;  %s2968_s7 = inlined_call_operand.vmem [shape: f32[1,32], index: 7, kind: input, shape index: {}]   ;;  %s2969_s8 = inlined_call_operand.hbm [shape: f32[32,64], index: 8, kind: input, shape index: {}]   ;;  %s2970_s9 = inlined_call_operand.vmem [shape: f32[1,64], index: 9, kind: input, shape index: {}]   ;;  %s2971_s10 = inlined_call_operand.vmem [shape: f32[64,32], index: 10, kind: input, shape index: {}]   ;;  %s2972_s11 = inlined_call_operand.vmem [shape: f32[1,32], index: 11, kind: input, shape index: {}]   ;;  %s2973_s12 = inlined_call_operand.vmem [shape: f32[1,32], index: 12, kind: input, shape index: {}]   ;;  %s2974_s13 = inlined_call_operand.vmem [shape: f32[1,32], index: 13, kind: input, shape index: {}]   ;;  %s2975_s14 = inlined_call_operand.hbm [shape: f32[2,8,32], index: 14, kind: output, shape index: {}]  }
   0x1   :  { %2983 = sst [smem:[#allocation18_spill]] %s2961_s0 }
   0x2   :  { %2984 = sst [smem:[#allocation19_spill]] %s2968_s7 }
   0x3   :  { %2985 = sst [smem:[#allocation20_spill]] %s2970_s9 }
   0x4   :  { %2986 = sst [smem:[#allocation21_spill]] %s2972_s11 }
   0x5   :  { %2987 = sst [smem:[#allocation22_spill]] %s2973_s12 }
   0x6   :  { %2988 = sst [smem:[#allocation23_spill]] %s2974_s13 }
   0x7   :  { %2989 = sst [smem:[#allocation24_spill]] %s2975_s14 }
   0x8   :  { %19 = vsyncpa [#allocation6], 0 }
   0x9   :  { %21 = vsyncpa [#allocation6 + $0x1], 0 }
   0xa   :  { %22 = vsyncpa [#allocation9], 0 }
   0xb   :  { %23 = vsyncpa [#allocation7], 0 }
   0xc   :  { %25 = vsyncpa [#allocation7 + $0x1], 0  ;;  %s2525_s29 = smov 0   ;;  %s2527_s30 = smov 0  }
   0xd   :  { %s2529_s15 = smov 0   ;;  %s2531_s16 = smov 0  }
   0xe   :  { %s2533_s17 = smov 0   ;;  %s2535_s18 = smov 0  }
   0xf LB: > { %2990 = sst [smem:[#allocation15_spill]] %s2413_s29  ;;  %s1895_s19 = sadd.s32 4294967295, %s2433_s18   ;;  %s2433_s18 = sphi %s2535_s18, %s31_s18   ;;  %s2429_s17 = sphi %s2533_s17, %s3020_s17   ;;  %s2425_s16 = sphi %s2531_s16, %s3019_s16   ;;  %s2421_s15 = sphi %s2529_s15, %s3018_s15   ;;  %s2417_s30 = sphi %s2527_s30, %s3017_s30   ;;  %s2413_s29 = sphi %s2525_s29, %s3016_s29  }
  0x10   : > { %2991 = sst [smem:[#allocation16_spill]] %s2425_s16  ;;  %s1896_s20 = sadd.s32 4294967294, %s2433_s18  }
  0x11   : > { %p63_p0 = scmp.ne.s32.totalorder %s2417_s30, %s2413_s29  ;;  %p2559_p1 = scmp.eq.s32.totalorder %s1895_s19, 0 }
  0x12   : > { %p2563_p2 = scmp.eq.s32.totalorder %s1895_s19, 1  ;;  %p368_p3 = scmp.eq.s32.totalorder %s1896_s20, 1 }
  0x13   : > { %s2992_s21 = scalar_select %p2559_p1, 1, 0 }
  0x14   : > { %p2569_p4 = por %p2559_p1, %p63_p0  ;;  %p1897_p5 = scmp.ge.s32.totalorder %s2433_s18, 1 }
  0x15   : > { %p2574_p6 = por %p368_p3, %p63_p0  ;;  %p375_p7 = scmp.lt.s32.totalorder %s2433_s18, 3 }
  0x16   : > { %s2994_s23 = scalar_select %p2569_p4, 1, 0 }
  0x17   : > { %s2995_s24 = scalar_select %p2574_p6, 1, 0 }
  0x18   : > { %p2579_p8 = pnand %p1897_p5, %p375_p7  ;;  %s2435_s26 = smov [#allocation8]  }
  0x19   : > { %2996 = sst [smem:[#allocation17_spill]] %s2995_s24  ;;  %s396_s27 = sshll.u32 %s2435_s26, 4  ;;  %s2583_s27 = int_to_ptr.vmem [resolvable:$true] %s396_s27 }
  0x1a   : > { %p2155_p9 = pneg %p2579_p8  ;;  %s2436_s19 = smov [#allocation10]  }
  0x1b   : > { %s418_s20 = sshll.u32 %s2436_s19, 4  ;;  %s2261_s26 = scalar_lea.hbm %s2965_s4, 512  ;;  %s2594_s20 = int_to_ptr.vmem [resolvable:$true] %s418_s20 }
  0x1c   : > { %p2590_p11 = pnand %p2155_p9, %p2559_p1  ;;  %p2262_p12 = scmp.ne.s32.totalorder %s2965_s4, %s2261_s26 }
  0x1d   : > { %p2268_p5 = scmp.lt.u32.totalorder %s2261_s26, %s2965_s4 }
  0x1e   : > { %p2263_p13 = pneg %p2590_p11 }
  0x20   : > { %p2264_p0 = pnand %p2263_p13, %p2262_p12 }
  0x22   : > { %p2265_p3 = pneg %p2264_p0 }
  0x24   : > { %p2270_p7 = pnand %p2268_p5, %p2265_p3 }
  0x26   : > { %2273 = shalt.err (!%p2270_p7)
}
  0x27   : > { %s2274_s29 = scalar_lea.vmem %s2583_s27, 512  ;;  %p2282_p1 = scmp.lt.s32.totalorder %s2583_s27, %s2583_s27 }
  0x28   : > { %p2275_p9 = scmp.ne.s32.totalorder %s2583_s27, %s2274_s29  ;;  %p2283_p12 = scmp.lt.s32.totalorder %s2274_s29, %s2274_s29 }
  0x2a   : > { %p2277_p10 = pnand %p2275_p9, %p2263_p13  ;;  %p2284_p0 = por %p2283_p12, %p2282_p1 }
  0x2c   : > { %p2278_p6 = pneg %p2277_p10 }
  0x2e   : > { %p2285_p4 = pnand %p2284_p0, %p2278_p6 }
  0x30   : > { %2288 = shalt.err (!%p2285_p4)
}
  0x31   : > { %s2437_s12 = smov 128   ;;  %s2438_s13 = smov 8  }
  0x32   : > { %2158 = dma.hbm_to_vmem [thread:$0]  (!%p2590_p11), %s2965_s4, 512, %s2583_s27, [#allocation9], %s2437_s12, %s2437_s12, %s2438_s13  }
  0x33   : > { %s2289_s26 = scalar_lea.hbm %s2969_s8, 512 }
  0x34   : > { %p2290_p1 = scmp.ne.s32.totalorder %s2969_s8, %s2289_s26  ;;  %p2296_p10 = scmp.lt.u32.totalorder %s2289_s26, %s2969_s8 }
  0x36   : > { %p2292_p4 = pnand %p2290_p1, %p2263_p13 }
  0x38   : > { %p2293_p6 = pneg %p2292_p4 }
  0x3a   : > { %p2298_p3 = pnand %p2296_p10, %p2293_p6 }
  0x3c   : > { %2301 = shalt.err (!%p2298_p3)
}
  0x3d   : > { %s2302_s27 = scalar_lea.vmem %s2594_s20, 512  ;;  %p2310_p12 = scmp.lt.s32.totalorder %s2594_s20, %s2594_s20 }
  0x3e   : > { %p2303_p5 = scmp.ne.s32.totalorder %s2594_s20, %s2302_s27  ;;  %p2311_p0 = scmp.lt.s32.totalorder %s2302_s27, %s2302_s27 }
  0x40   : > { %p2305_p7 = pnand %p2303_p5, %p2263_p13  ;;  %p2312_p1 = por %p2311_p0, %p2310_p12 }
  0x42   : > { %p2306_p9 = pneg %p2305_p7 }
  0x44   : > { %p2313_p4 = pnand %p2312_p1, %p2306_p9 }
  0x46   : > { %2316 = shalt.err (!%p2313_p4)
}
  0x47   : > { %2161 = dma.hbm_to_vmem [thread:$0]  (!%p2590_p11), %s2969_s8, 512, %s2594_s20, [#allocation9], %s2437_s12, %s2437_s12, %s2438_s13  }
  0x48   : > { %s43_s11 = sadd.s32 1, %s2429_s17  ;;  %s50_s14 = sadd.s32 1, %s2421_s15 }
  0x49   : > { %p45_p13 = scmp.ge.s32.totalorder %s43_s11, 2  ;;  %p57_p6 = scmp.ne.s32.totalorder %s2421_s15, %s2417_s30 }
  0x4a   : > { %p58_p10 = scmp.eq.s32.totalorder %s2433_s18, 0  ;;  %p2172_p3 = scmp.lt.s32.totalorder %s2433_s18, 2 }
  0x4b   : > { %s3022_s11 = smov (%p45_p13, %s43_s11), 0  ;;  %p2658_p7 = por %p2563_p2, %p57_p6 }
  0x4c   : > { %p59_p5 = por %p58_p10, %p57_p6  ;;  %s47_s16 = ssub.s32 %s2429_s17, %s3022_s11 }
  0x4d   : > { %s2999_s28 = scalar_select %p2658_p7, 1, 0 }
  0x4e   : > { %s447_s24 = sand.u32 1, %s2421_s15   ;;  %p48_p9 = scmp.eq.s32.totalorder %s47_s16, 0 }
  0x4f   : > { %s1901_s20 = sshll.u32 %s447_s24, 3  ;;  %s1902_s12 = sshll.u32 %s2429_s17, 7 }
  0x50   : > { %s2667_s13 = scalar_select %p48_p9, %s2421_s15, %s50_s14  }
  0x51   : > { %s3000_s0 = sld [smem:[#allocation18_spill]]  ;;  %s451_s22 = scalar_lea.vmem [#allocation5], %s1901_s20 }
  0x52   : > { %s458_s27 = sshll.u32 %s451_s22, 4  ;;  %p2676_p2 = pnand %p2172_p3, %p59_p5  ;;  %s2680_s27 = int_to_ptr.vmem [resolvable:$true] %s458_s27 }
  0x53   : > { %s448_s9 = scalar_lea.sflag [#allocation6], %s447_s24 }
  0x54   : > { %p2319_p12 = pneg %p2676_p2 }
  0x57   : > { %s2672_s29 = scalar_lea.hbm %s3000_s0, %s1902_s12  ;;  %s2322_s12 = scalar_lea.hbm %s3000_s0, 256 }
  0x58   : > { %s2317_s14 = scalar_lea.hbm %s2672_s29, 128  ;;  %p2323_p4 = scmp.lt.u32.totalorder %s2672_s29, %s3000_s0 }
  0x59   : > { %p2318_p11 = scmp.ne.s32.totalorder %s2672_s29, %s2317_s14  ;;  %p2324_p13 = scmp.lt.u32.totalorder %s2322_s12, %s2317_s14 }
  0x5a   : > { %p2326_p10 = scmp.lt.u32.totalorder %s2317_s14, %s2672_s29 }
  0x5b   : > { %p2320_p0 = pnand %p2319_p12, %p2318_p11  ;;  %p2325_p6 = por %p2324_p13, %p2323_p4 }
  0x5d   : > { %p2321_p1 = pneg %p2320_p0  ;;  %p2327_p3 = por %p2326_p10, %p2325_p6 }
  0x5f   : > { %p2328_p5 = pnand %p2327_p3, %p2321_p1 }
  0x61   : > { %2331 = shalt.err (!%p2328_p5)
}
  0x62   : > { %s2332_s24 = scalar_lea.vmem %s2680_s27, 128  ;;  %s2439_s22 = smov [#allocation5]  }
  0x63   : > { %p2333_p9 = scmp.ne.s32.totalorder %s2680_s27, %s2332_s24  ;;  %s2337_s16 = sshll.u32 %s2439_s22, 4  ;;  %s2338_s16 = int_to_ptr.vmem [resolvable:$false] %s2337_s16 }
  0x64   : > { %s2339_s20 = scalar_lea.vmem %s2338_s16, 256  ;;  %p2340_p7 = scmp.lt.s32.totalorder %s2680_s27, %s2338_s16 }
  0x65   : > { %p2335_p11 = pnand %p2333_p9, %p2319_p12  ;;  %p2341_p4 = scmp.lt.s32.totalorder %s2339_s20, %s2332_s24 }
  0x67   : > { %p2336_p0 = pneg %p2335_p11  ;;  %p2342_p13 = por %p2341_p4, %p2340_p7 }
  0x69   : > { %p2343_p6 = pnand %p2342_p13, %p2336_p0 }
  0x6b   : > { %2346 = shalt.err (!%p2343_p6)
}
  0x6c   : > { %2165 = dma.hbm_to_vmem [thread:$0]  (!%p2676_p2), %s2672_s29, 128, %s2680_s27, %s448_s9  }
  0x6d   : > { %467 = sbr.rel (%p2579_p8) target bundleno = 2654 (0xa5e), region = 76  ;;  %s2710_s14 = sand.u32 (!%p2579_p8), 1, %s2417_s30  }
  0x6e   : > { %s1904_s12 = sshll.u32 (!%p2579_p8), %s2710_s14, 3  ;;  %s470_s19 = scalar_lea.sflag (!%p2579_p8), [#allocation6], %s2710_s14 }
  0x6f   : > { %s2716_s26 = scalar_lea.vmem (!%p2579_p8), [#allocation5], %s1904_s12  ;;  %p3002_p7 = scmp.ne.s32.totalorder (!%p2579_p8), %s2994_s23, 0 }
  0x74   : > { %2400 = dma.done.wait (%p3002_p7), %s470_s19, 128  }
  0x75   : > { %2402 = vsyncadd (%p3002_p7), %s470_s19, 4294967168  ;;  %p3003_p2 = scmp.ne.s32.totalorder %s2992_s21, 0 }
  0x77   : > { %2404 = dma.done.wait (%p3003_p2), [#allocation9], 1024  }
  0x78   : > { %2406 = vsyncadd (%p3003_p2), [#allocation9], 4294966272  ;;  %v2440_v0 = vmov 0.0|0.0   ;;  %vm2441_vm0 = vmmov 0   ;;  %v2442_v1 = vmov 0.0   ;;  %v531_v2 = vld [vmem:[%s2963_s2] sm:$0xff] }
  0x79   : > { %2101 = vmatprep.subr.bf16.mxu1 %v2440_v0  ;;  %1995 = vmatprep.mubr.msk.f32.mxu1 %vm2441_vm0, %v2442_v1  ;;  %v532_v3 = vld [vmem:[%s2963_s2 + $0x8] sm:$0xff]  ;;  %v533_v4 = vld [vmem:[%s2963_s2 + $0x10] sm:$0xff]  ;;  %v534_v6 = vld [vmem:[%s2963_s2 + $0x18] sm:$0xff]  ;;  %vm535_vm1 = vcmask 261120   ;;  %vm769_vm2 = vcmask 64512   ;;  %s2443_s19 = smov 112  }
  0x7a   : > { %2113 = vmatprep.subr.bf16.mxu0 %v2440_v0  ;;  %2017 = vmatprep.mubr.msk.f32.mxu0 %vm2441_vm0, %v2442_v1  ;;  %v2102_v5 = vpack.c.bf16 %v532_v3, %v531_v2  ;;  %v688_v7 = vld [vmem:[%s2962_s1] sm:$0xff]  ;;  %v689_v8 = vld [vmem:[%s2962_s1 + $0x8] sm:$0xff]  ;;  %v690_v9 = vld [vmem:[%s2962_s1 + $0x10] sm:$0xff]  ;;  %v2105_v11 = vpack.c.bf16 %v534_v6, %v533_v4  ;;  %s2444_s23 = smov 120   ;;  %s2445_s25 = smov 104   ;;  %vm1101_vm3 = vcmask 130112  }
  0x7b   : > { %v691_v10 = vld [vmem:[%s2962_s1 + $0x18] sm:$0xff]  ;;  %v2114_v12 = vpack.c.bf16 %v689_v8, %v688_v7  ;;  %v610_v13 = vld [vmem:[%s2964_s3] sm:$0xff]  ;;  %v611_v14 = vld [vmem:[%s2964_s3 + $0x8] sm:$0xff]  ;;  %s2446_s29 = smov 8   ;;  %s2447_s21 = smov 16   ;;  %vm1272_vm4 = vcmask 195712  }
  0x7c   : > { %2103 = vmatpush3.bf16.msra.mxu1 %v2102_v5  ;;  %v2117_v15 = vpack.c.bf16 %v691_v10, %v690_v9  ;;  %v2765_v16 = vld [vmem:[%s2716_s26] sm:$0xff]  ;;  %v2108_v17 = vpack.c.bf16 %v611_v14, %v610_v13  ;;  %v612_v18 = vld [vmem:[%s2964_s3 + $0x10] sm:$0xff]  ;;  %s2448_s27 = smov 24   ;;  %vm1443_vm5 = vcmask 261312   ;;  %s3004_s16 = sld [smem:[#allocation19_spill]]  ;;  %vm1668_vm8 = vcmask 523264  }
  0x7d   : > { %2104 = vmatprep.subr.bf16.mxu1 %v2440_v0  ;;  %2115 = vmatpush3.bf16.msra.mxu0 %v2114_v12  ;;  %v613_v19 = vld [vmem:[%s2964_s3 + $0x18] sm:$0xff]  ;;  %s3006_s24 = sld [smem:[#allocation21_spill]]  ;;  %s3007_s26 = sld [smem:[#allocation16_spill]] }
  0x7e   : > { %2116 = vmatprep.subr.bf16.mxu0 %v2440_v0  ;;  %v2111_v20 = vpack.c.bf16 %v613_v19, %v612_v18  ;;  %s3008_s20 = sld [smem:[#allocation22_spill]]  ;;  %s1781_s22 = scalar_lea.sflag [#allocation7], %s2710_s14 }
  0x7f   : > { %p3011_p12 = scmp.ne.s32.totalorder %s2999_s28, 0 }
  0x80   : > { %2106 = vmatpush3.bf16.msra.mxu1 %v2105_v11 }
  0x81   : > { %2107 = vmatprep.subr.bf16.mxu1 %v2440_v0  ;;  %2118 = vmatpush3.bf16.msra.mxu0 %v2117_v15 }
  0x82   : > { %2030 = vmatprep.subr.mxu0 %v2442_v1 }
  0x83   : > { %1996 = vmatmul.mubr.msk.f32.vlgmr.msra.gmra.mrb[0].mxu1 %vm535_vm1, %v2765_v16 }
  0x84   : > { %2109 = vmatpush3.bf16.msra.mxu1 %v2108_v17  ;;  %2006 = vmatprep.mubr.msk.f32.mxu1 %vm2441_vm0, %v2442_v1 }
  0x85   : > { %2018 = vmatmul.mubr.msk.f32.vlgmr.msra.gmra.mrb[0].mxu0 %vm535_vm1, %v2765_v16  ;;  %2110 = vmatprep.subr.bf16.mxu1 %v2440_v0 }
  0x86   : > { %2032 = vmatprep.mubr.msk.f32.mxu0 %vm2441_vm0, %v2442_v1 }
  0x88   : > { %2112 = vmatpush3.bf16.msra.mxu1 %v2111_v20 }
  0x89   : > { %2020 = vmatprep.subr.mxu1 %v2442_v1 }
  0x8b   : > { %2007 = vmatmul.mubr.msk.f32.vlgmr.msra.gmra.mrb[2].mxu1 %vm535_vm1, %v2765_v16 }
  0x8c   : > { %2022 = vmatprep.mubr.msk.f32.mxu1 %vm2441_vm0, %v2442_v1 }
 0x156   : > { %v605_v21 = vpop.f32.mrb[0].mxu1 }
 0x157   : > { %609 = vst.msk [vmem:[#allocation2] sm:$0xff] %vm535_vm1, %v605_v21  ;;  %v1997_v22 = vpop.f32.mrb[1].mxu1 }
 0x158   : > { %v762_v23 = vpop.f32.mrb[0].mxu0 }
 0x159   : > { %v2019_v24 = vpop.f32.mrb[1].mxu0  ;;  %v766_v26 = vmul.f32 0.35355338, %v762_v23 }
 0x15a   : > { %v1446_v24 = vld [vmem:[#allocation8] sm:$0xff] }
 0x15e   : > { %v767_v25 = vld [vmem:[#allocation2] sm:$0xff]  ;;  %v680_v27 = vpop.f32.mrb[2].mxu1 }
 0x15f   : > { %1105 = vrot.lane.b32.xlu1 %v767_v25, %s2443_s19  ;;  %933 = vrot.lane.b32.xlu0 %v767_v25, %s2444_s23  ;;  %684 = vst.msk [vmem:[#allocation3] sm:$0xff] %vm535_vm1, %v680_v27  ;;  %v2008_v28 = vpop.f32.mrb[3].mxu1  ;;  %v1448_v27 = vld [vmem:[#allocation8 + $0x10] sm:$0xff] }
 0x160   : > { %2021 = vmatpush3.xpose.msk.msra.mxu1 %vm769_vm2, %v767_v25  ;;  %v1449_v28 = vld [vmem:[#allocation8 + $0x18] sm:$0xff] }
 0x161   : > { %2025 = vmatprep.subr.mxu1 %v2442_v1 }
 0x163   : > { %2023 = vmatmul.mubr.msk.f32.vlgmr.msra.gmra.mrb[4].mxu1 %vm769_vm2, %v766_v26  ;;  %1103 = vrot.lane.b32.xlu1 %v766_v26, %s2443_s19 }
 0x164   : > { %931 = vrot.lane.b32.xlu0 %v766_v26, %s2444_s23  ;;  %2027 = vmatprep.mubr.msk.f32.mxu1 %vm2441_vm0, %v2442_v1 }
 0x166   : > { %v768_v35 = vld [vmem:[#allocation3] sm:$0xff] }
 0x167   : > { %1274 = vrot.lane.b32.xlu1 %v766_v26, %s2445_s25  ;;  %2026 = vmatpush3.msra.mxu1 %v768_v35 }
 0x168   : > { %1276 = vrot.lane.b32.xlu0 %v767_v25, %s2445_s25  ;;  %2035 = vmatprep.subr.mxu1 %v2442_v1  ;;  %v1447_v25 = vld [vmem:[#allocation8 + $0x8] sm:$0xff] }
 0x169   : > { %v2120_v26 = vpack.c.bf16 %v1447_v25, %v1446_v24  ;;  %v1929_v24 = vld [vmem:[%s3006_s24] ss:$0 sm:$0xff]  ;;  %s3010_s24 = sld [smem:[#allocation24_spill]] }
 0x1d1   : > { %v934_v29 = vpop.permute.xlu0 %933  ;;  %v1106_v30 = vpop.permute.xlu1 %1105 }
 0x1d2   : > { %2031 = vmatpush3.xpose.msk.msra.mxu0 %vm769_vm2, %v934_v29  ;;  %v2123_v29 = vpack.c.bf16 %v1449_v28, %v1448_v27 }
 0x1d3   : > { %2040 = vmatprep.subr.mxu0 %v2442_v1 }
 0x1d5   : > { %v1104_v32 = vpop.permute.xlu1 %1103 }
 0x1d6   : > { %v932_v31 = vpop.permute.xlu0 %931 }
 0x1d7   : > { %2033 = vmatmul.mubr.msk.f32.vlgmr.msra.gmra.mrb[2].mxu0 %vm769_vm2, %v932_v31 }
 0x1d8   : > { %2041 = vmatpush3.xpose.msk.msra.mxu0 %vm769_vm2, %v1106_v30  ;;  %2042 = vmatprep.mubr.msk.f32.mxu0 %vm2441_vm0, %v2442_v1 }
 0x1d9   : > { %2050 = vmatprep.subr.mxu0 %v2442_v1  ;;  %v1275_v34 = vpop.permute.xlu1 %1274 }
 0x1da   : > { %v1277_v33 = vpop.permute.xlu0 %1276 }
 0x1db   : > { %2043 = vmatmul.mubr.msk.f32.vlgmr.msra.gmra.mrb[4].mxu0 %vm769_vm2, %v1104_v32 }
 0x1dc   : > { %2051 = vmatpush3.xpose.msk.msra.mxu0 %vm769_vm2, %v1277_v33  ;;  %2052 = vmatprep.mubr.msk.f32.mxu0 %vm2441_vm0, %v2442_v1 }
 0x1dd   : > { %2119 = vmatprep.subr.bf16.mxu0 %v2440_v0 }
 0x1df   : > { %2053 = vmatmul.mubr.msk.f32.vlgmr.msra.gmra.mrb[6].mxu0 %vm769_vm2, %v1275_v34 }
 0x1e0   : > { %2068 = vmatprep.mubr.msk.f32.mxu0 %vm2441_vm0, %v2442_v1  ;;  %2121 = vmatpush3.bf16.msra.mxu0 %v2120_v26 }
 0x1e1   : > { %2122 = vmatprep.subr.bf16.mxu0 %v2440_v0 }
 0x1e4   : > { %2124 = vmatpush3.bf16.msra.mxu0 %v2123_v29 }
 0x1e5   : > { %2131 = vmatprep.subr.bf16.mxu0 %v2440_v0 }
 0x236   : > { %v842_v36 = vpop.f32.mrb[4].mxu1 }
 0x237   : > { %v2024_v37 = vpop.f32.mrb[5].mxu1  ;;  %v846_v38 = vsel %vm769_vm2, %v842_v36, -inf }
 0x238   : > { %847 = vmax.xlane.f32.xlu0 %v846_v38 }
 0x2aa   : > { %v1005_v39 = vpop.f32.mrb[2].mxu0 }
 0x2ab   : > { %v2034_v40 = vpop.f32.mrb[3].mxu0  ;;  %v1009_v41 = vsel %vm769_vm2, %v1005_v39, -inf }
 0x2ac   : > { %1010 = vmax.xlane.f32.xlu1 %v1009_v41  ;;  %v1923_v40 = vld [vmem:[%s2966_s5] ss:$0 sm:$0xff] }
 0x2ae   : > { %v1177_v42 = vpop.f32.mrb[4].mxu0 }
 0x2af   : > { %v2044_v43 = vpop.f32.mrb[5].mxu0  ;;  %v1181_v44 = vsel %vm769_vm2, %v1177_v42, -inf }
 0x2b0   : > { %1182 = vmax.xlane.f32.xlu0 %v1181_v44 }
 0x2b2   : > { %v1348_v45 = vpop.f32.mrb[6].mxu0 }
 0x2b3   : > { %v2054_v46 = vpop.f32.mrb[7].mxu0  ;;  %v1352_v47 = vsel %vm769_vm2, %v1348_v45, -inf }
 0x2b4   : > { %1353 = vmax.xlane.f32.xlu0 %v1352_v47 }
 0x2bd   : > { %1021 = vrot.lane.b32.xlu1 %v768_v35, %s2444_s23 }
 0x2c5   : > { %v848_v48 = vpop.xlane.xlu0 %847 }
 0x2c6   : > { %v849_v49 = vsub.f32 %v842_v36, %v848_v48 }
 0x2c8   : > { %v850_v50 = vmul.f32 1.442695, %v849_v49 }
 0x2ca   : > { %2237 = vpow2.f32 %v850_v50 }
 0x2d4   : > { %v2238_v51 = vpop.eup %2237 }
 0x2d5   : > { %v852_v52 = vsel %vm769_vm2, %v2238_v51, 0.0 }
 0x2e1   : > { %853 = vadd.xlane.f32.xlu1 %v852_v52  ;;  %v1570_v52 = vld [vmem:[#allocation10 + $0x10] sm:$0xff] }
 0x339   : > { %v1011_v53 = vpop.xlane.xlu1 %1010 }
 0x33a   : > { %v1012_v54 = vsub.f32 %v1005_v39, %v1011_v53 }
 0x33c   : > { %v1013_v55 = vmul.f32 1.442695, %v1012_v54  ;;  %v1571_v54 = vld [vmem:[#allocation10 + $0x18] sm:$0xff] }
 0x33d   : > { %v1183_v56 = vpop.xlane.xlu0 %1182  ;;  %v1022_v6 = vpop.permute.xlu1 %1021 }
 0x33e   : > { %2239 = vpow2.f32 %v1013_v55  ;;  %v1184_v57 = vsub.f32 %v1177_v42, %v1183_v56  ;;  %v2129_v55 = vpack.c.bf16 %v1571_v54, %v1570_v52  ;;  %v1654_v56 = vld [vmem:[%s2971_s10 + $0x8] sm:$0xff] }
 0x340   : > { %v1185_v58 = vmul.f32 1.442695, %v1184_v57  ;;  %v1655_v57 = vld [vmem:[%s2971_s10 + $0x10] sm:$0xff] }
 0x341   : > { %v1354_v59 = vpop.xlane.xlu0 %1353 }
 0x342   : > { %2241 = vpow2.f32 %v1185_v58  ;;  %v1355_v60 = vsub.f32 %v1348_v45, %v1354_v59  ;;  %v1656_v59 = vld [vmem:[%s2971_s10 + $0x18] sm:$0xff] }
 0x344   : > { %v1356_v61 = vmul.f32 1.442695, %v1355_v60  ;;  %v2135_v60 = vpack.c.bf16 %v1656_v59, %v1655_v57 }
 0x346   : > { %2243 = vpow2.f32 %v1356_v61  ;;  %v1657_v61 = vld [vmem:[%s2971_s10 + $0x20] sm:$0xff] }
 0x348   : > { %v2240_v62 = vpop.eup %2239 }
 0x349   : > { %v1015_v63 = vsel %vm769_vm2, %v2240_v62, 0.0 }
 0x34a   : > { %1016 = vadd.xlane.f32.xlu0 %v1015_v63 }
 0x34c   : > { %v2242_v2 = vpop.eup %2241 }
 0x34d   : > { %v1187_v3 = vsel %vm769_vm2, %v2242_v2, 0.0 }
 0x34e   : > { %1188 = vadd.xlane.f32.xlu1 %v1187_v3 }
 0x350   : > { %v2244_v4 = vpop.eup %2243 }
 0x351   : > { %v1358_v5 = vsel %vm769_vm2, %v2244_v4, 0.0 }
 0x352   : > { %1359 = vadd.xlane.f32.xlu0 %v1358_v5 }
 0x35f   : > { %1363 = vrot.lane.b32.xlu1 %v768_v35, %s2445_s25  ;;  %s3009_s25 = sld [smem:[#allocation23_spill]] }
 0x368   : > { %1192 = vrot.lane.b32.xlu0 %v768_v35, %s2443_s19 }
 0x36e   : > { %v854_v7 = vpop.xlane.xlu1 %853 }
 0x36f   : > { %2245 = vrcp.f32 %v854_v7 }
 0x379   : > { %v2246_v8 = vpop.eup %2245 }
 0x37a   : > { %v856_v9 = vmul.f32 %v2246_v8, %v2238_v51  ;;  %v1569_v51 = vld [vmem:[#allocation10 + $0x8] sm:$0xff] }
 0x37c   : > { %2028 = vmatmul.mubr.msk.f32.vlgmr.msra.gmra.mrb[6].mxu1 %vm769_vm2, %v856_v9 }
 0x37d   : > { %2036 = vmatpush3.msra.mxu1 %v1022_v6  ;;  %2037 = vmatprep.mubr.msk.f32.mxu1 %vm2441_vm0, %v2442_v1 }
 0x37e   : > { %2045 = vmatprep.subr.mxu1 %v2442_v1 }
 0x3d7   : > { %v1017_v10 = vpop.xlane.xlu0 %1016 }
 0x3d8   : > { %2247 = vrcp.f32 %v1017_v10  ;;  %v1925_v10 = vld [vmem:[%s2967_s6] ss:$0 sm:$0xff] }
 0x3db   : > { %v1189_v11 = vpop.xlane.xlu1 %1188 }
 0x3dc   : > { %2249 = vrcp.f32 %v1189_v11 }
 0x3df   : > { %v1360_v12 = vpop.xlane.xlu0 %1359  ;;  %v1364_v19 = vpop.permute.xlu1 %1363 }
 0x3e0   : > { %2251 = vrcp.f32 %v1360_v12 }
 0x3e2   : > { %v2248_v13 = vpop.eup %2247 }
 0x3e3   : > { %v1019_v14 = vmul.f32 %v2248_v13, %v2240_v62  ;;  %v1193_v15 = vpop.permute.xlu0 %1192  ;;  %v1658_v62 = vld [vmem:[%s2971_s10 + $0x28] sm:$0xff] }
 0x3e4   : > { %v2138_v63 = vpack.c.bf16 %v1658_v62, %v1657_v61 }
 0x3e5   : > { %2038 = vmatmul.mubr.msk.f32.vlgmr.msra.gmra.mrb[8].mxu1 %vm769_vm2, %v1019_v14 }
 0x3e6   : > { %v2250_v17 = vpop.eup %2249  ;;  %2046 = vmatpush3.msra.mxu1 %v1193_v15  ;;  %2047 = vmatprep.mubr.msk.f32.mxu1 %vm2441_vm0, %v2442_v1  ;;  %v1659_v15 = vld [vmem:[%s2971_s10 + $0x30] sm:$0xff] }
 0x3e7   : > { %v1191_v18 = vmul.f32 %v2250_v17, %v2242_v2  ;;  %2055 = vmatprep.subr.mxu1 %v2442_v1  ;;  %v1660_v17 = vld [vmem:[%s2971_s10 + $0x38] sm:$0xff] }
 0x3e9   : > { %2048 = vmatmul.mubr.msk.f32.vlgmr.msra.gmra.mrb[10].mxu1 %vm769_vm2, %v1191_v18  ;;  %v2141_v18 = vpack.c.bf16 %v1660_v17, %v1659_v15 }
 0x3ea   : > { %v2252_v20 = vpop.eup %2251  ;;  %2056 = vmatpush3.msra.mxu1 %v1364_v19  ;;  %2057 = vmatprep.mubr.msk.f32.mxu1 %vm2441_vm0, %v2442_v1 }
 0x3eb   : > { %v1362_v21 = vmul.f32 %v2252_v20, %v2244_v4  ;;  %2125 = vmatprep.subr.bf16.mxu1 %v2440_v0 }
 0x3ed   : > { %2058 = vmatmul.mubr.msk.f32.vlgmr.msra.gmra.mrb[12].mxu1 %vm769_vm2, %v1362_v21 }
 0x3ee   : > { %2079 = vmatprep.mubr.msk.f32.mxu1 %vm2441_vm0, %v2442_v1 }
 0x44f   : > { %v926_v22 = vpop.f32.mrb[6].mxu1 }
 0x450   : > { %930 = vst.msk [vmem:[#allocation4] sm:$0xff] %vm769_vm2, %v926_v22  ;;  %v2029_v23 = vpop.f32.mrb[7].mxu1 }
 0x4b8   : > { %v1093_v30 = vpop.f32.mrb[8].mxu1 }
 0x4b9   : > { %1098 = vrot.lane.b32.xlu1 %v1093_v30, %s2446_s29  ;;  %v2039_v31 = vpop.f32.mrb[9].mxu1  ;;  %s1934_s29 = sshll.u32 %s3007_s26, 7 }
 0x4ba   : > { %s2911_s0 = scalar_lea.hbm %s3010_s24, %s1934_s29 }
 0x4bc   : > { %v1264_v32 = vpop.f32.mrb[10].mxu1 }
 0x4bd   : > { %1269 = vrot.lane.b32.xlu0 %v1264_v32, %s2447_s21  ;;  %v2049_v33 = vpop.f32.mrb[11].mxu1  ;;  %s525_s21 = scalar_lea.vmem [#allocation11], %s1904_s12  ;;  %s2449_s12 = smov [#allocation11]  }
 0x4be   : > { %s2351_s26 = sshll.u32 %s2449_s12, 4  ;;  %s2352_s26 = int_to_ptr.vmem [resolvable:$false] %s2351_s26 }
 0x4c0   : > { %v1435_v34 = vpop.f32.mrb[12].mxu1 }
 0x4c1   : > { %1440 = vrot.lane.b32.xlu1 %v1435_v34, %s2448_s27  ;;  %v2059_v35 = vpop.f32.mrb[13].mxu1  ;;  %s3005_s27 = sld [smem:[#allocation20_spill]] }
 0x4c7   : > { %v1927_v19 = vld [vmem:[%s3005_s27] ss:$0 sm:$0xff]  ;;  %s1795_s27 = sshll.u32 %s525_s21, 4  ;;  %s2913_s27 = int_to_ptr.vmem [resolvable:$true] %s1795_s27 }
 0x4c8   : > { %p2354_p3 = scmp.lt.s32.totalorder %s2913_s27, %s2352_s26 }
 0x52b   : > { %v1099_v36 = vpop.permute.xlu1 %1098 }
 0x52c   : > { %1102 = vst.msk [vmem:[#allocation4] sm:$0xff] %vm1101_vm3, %v1099_v36 }
 0x52f   : > { %v1270_v37 = vpop.permute.xlu0 %1269 }
 0x530   : > { %1273 = vst.msk [vmem:[#allocation4] sm:$0xff] %vm1272_vm4, %v1270_v37 }
 0x533   : > { %v1441_v38 = vpop.permute.xlu1 %1440 }
 0x534   : > { %1444 = vst.msk [vmem:[#allocation4] sm:$0xff] %vm1443_vm5, %v1441_v38 }
 0x53b   : > { %v1445_v39 = vld [vmem:[#allocation4] sm:$0xff] }
 0x53c   : > { %2069 = vmatmul.mubr.msk.f32.vlgmr.msra.gmra.mrb[8].mxu0 %vm535_vm1, %v1445_v39 }
 0x53d   : > { %2098 = vmatprep.mubr.msk.f32.mxu0 %vm2441_vm0, %v2442_v1  ;;  %v1568_v1 = vld [vmem:[#allocation10] sm:$0xff] }
 0x53e   : > { %v2126_v53 = vpack.c.bf16 %v1569_v51, %v1568_v1 }
 0x540   : > { %2127 = vmatpush3.bf16.msra.mxu1 %v2126_v53 }
 0x541   : > { %2128 = vmatprep.subr.bf16.mxu1 %v2440_v0 }
 0x544   : > { %2130 = vmatpush3.bf16.msra.mxu1 %v2129_v55 }
 0x60f   : > { %v1526_v41 = vpop.f32.mrb[8].mxu0 }
 0x610   : > { %v1527_v42 = vadd.f32 %v1923_v40, %v1526_v41  ;;  %v2070_v43 = vpop.f32.mrb[9].mxu0 }
 0x611   : > { %v1931_v43 = vld [vmem:[%s3008_s20] ss:$0 sm:$0xff]  ;;  %s2353_s20 = scalar_lea.vmem %s2352_s26, 256 }
 0x612   : > { %v1530_v44 = vadd.f32 %v1527_v42, %v2765_v16  ;;  %v1653_v16 = vld [vmem:[%s2971_s10] sm:$0xff] }
 0x613   : > { %v2132_v58 = vpack.c.bf16 %v1654_v56, %v1653_v16 }
 0x614   : > { %v1533_v45 = vsel %vm535_vm1, %v1530_v44, 0.0 }
 0x615   : > { %1534 = vadd.xlane.f32.xlu0 %v1533_v45  ;;  %2133 = vmatpush3.bf16.msra.mxu0 %v2132_v58 }
 0x616   : > { %2134 = vmatprep.subr.bf16.mxu0 %v2440_v0 }
 0x619   : > { %2136 = vmatpush3.bf16.msra.mxu0 %v2135_v60 }
 0x61a   : > { %2137 = vmatprep.subr.bf16.mxu0 %v2440_v0 }
 0x61d   : > { %2139 = vmatpush3.bf16.msra.mxu0 %v2138_v63 }
 0x61e   : > { %2140 = vmatprep.subr.bf16.mxu0 %v2440_v0  ;;  %v1926_v0 = vld [vmem:[%s3004_s16] ss:$0 sm:$0xff]  ;;  %s2347_s16 = scalar_lea.vmem %s2913_s27, 128 }
 0x61f   : > { %p2348_p8 = scmp.ne.s32.totalorder %s2913_s27, %s2347_s16  ;;  %p2355_p5 = scmp.lt.s32.totalorder %s2353_s20, %s2347_s16 }
 0x621   : > { %2142 = vmatpush3.bf16.msra.mxu0 %v2141_v18  ;;  %p2349_p1 = pnand %p2348_p8, %p3011_p12  ;;  %p2356_p9 = por %p2355_p5, %p2354_p3 }
 0x623   : > { %p2350_p10 = pneg %p2349_p1 }
 0x625   : > { %p2357_p11 = pnand %p2356_p9, %p2350_p10 }
 0x6a2   : > { %v1535_v46 = vpop.xlane.xlu0 %1534 }
 0x6a3   : > { %v1537_v47 = vmul.f32 0.03125, %v1535_v46  ;;  %v1932_v46 = vld [vmem:[%s3009_s25] ss:$0 sm:$0xff] }
 0x6a5   : > { %v1538_v48 = vsub.f32 %v1530_v44, %v1537_v47 }
 0x6a7   : > { %v1539_v49 = vmul.f32 %v1538_v48, %v1538_v48  ;;  %v1557_v11 = vmul.f32 %v1925_v10, %v1538_v48 }
 0x6a9   : > { %v1540_v50 = vsel %vm535_vm1, %v1539_v49, 0.0 }
 0x6aa   : > { %1541 = vadd.xlane.f32.xlu1 %v1540_v50 }
 0x737   : > { %v1542_v2 = vpop.xlane.xlu1 %1541 }
 0x738   : > { %v1543_v3 = vmul.f32 0.032258064, %v1542_v2 }
 0x73a   : > { %2253 = vrsqrt.f32 %v1543_v3  ;;  %vm1546_vm6 = vcmp.eq.f32.partialorder %v1543_v3, inf  ;;  %v1549_v6 = vand.u32 2147483648, %v1543_v3  ;;  %vm1548_vm7 = vcmp.eq.f32.partialorder %v1543_v3, 0.0 }
 0x744   : > { %v2254_v4 = vpop.eup %2253 }
 0x745   : > { %v1545_v5 = vmul.f32 %v2254_v4, %v1543_v3 }
 0x747   : > { %v1547_v7 = vsel %vm1546_vm6, %v1543_v3, %v1545_v5 }
 0x748   : > { %v1550_v8 = vsel %vm1548_vm7, %v1549_v6, %v1547_v7 }
 0x749   : > { %v1558_v9 = vadd.f32 1e-06, %v1550_v8 }
 0x74b   : > { %2255 = vrcp.f32 %v1558_v9 }
 0x755   : > { %v2256_v12 = vpop.eup %2255 }
 0x756   : > { %v1560_v13 = vmul.f32 %v2256_v12, %v1557_v11 }
 0x758   : > { %v1567_v14 = vadd.f32 %v1926_v0, %v1560_v13 }
 0x75a   : > { %2080 = vmatmul.mubr.msk.f32.vlgmr.msra.gmra.mrb[14].mxu1 %vm535_vm1, %v1567_v14 }
 0x82d   : > { %v1648_v20 = vpop.f32.mrb[14].mxu1 }
 0x82e   : > { %v1649_v21 = vadd.f32 %v1927_v19, %v1648_v20  ;;  %v2081_v22 = vpop.f32.mrb[15].mxu1 }
 0x830   : > { %v1652_v23 = vmax.f32 %v1649_v21, 0.0 }
 0x832   : > { %2099 = vmatmul.mubr.msk.f32.vlgmr.msra.gmra.mrb[10].mxu0 %vm1668_vm8, %v1652_v23 }
 0x905   : > { %v1738_v25 = vpop.f32.mrb[10].mxu0 }
 0x906   : > { %v1739_v26 = vadd.f32 %v1929_v24, %v1738_v25  ;;  %v2100_v27 = vpop.f32.mrb[11].mxu0 }
 0x908   : > { %v1742_v28 = vadd.f32 %v1739_v26, %v1567_v14 }
 0x90a   : > { %v1745_v29 = vsel %vm535_vm1, %v1742_v28, 0.0 }
 0x90b   : > { %1746 = vadd.xlane.f32.xlu0 %v1745_v29 }
 0x998   : > { %v1747_v30 = vpop.xlane.xlu0 %1746 }
 0x999   : > { %v1748_v31 = vmul.f32 0.03125, %v1747_v30 }
 0x99b   : > { %v1749_v32 = vsub.f32 %v1742_v28, %v1748_v31 }
 0x99d   : > { %v1750_v33 = vmul.f32 %v1749_v32, %v1749_v32  ;;  %v1768_v44 = vmul.f32 %v1931_v43, %v1749_v32 }
 0x99f   : > { %v1751_v34 = vsel %vm535_vm1, %v1750_v33, 0.0 }
 0x9a0   : > { %1752 = vadd.xlane.f32.xlu0 %v1751_v34 }
 0xa2d   : > { %v1753_v35 = vpop.xlane.xlu0 %1752 }
 0xa2e   : > { %v1754_v36 = vmul.f32 0.032258064, %v1753_v35 }
 0xa30   : > { %2257 = vrsqrt.f32 %v1754_v36  ;;  %vm1757_vm9 = vcmp.eq.f32.partialorder %v1754_v36, inf  ;;  %v1760_v39 = vand.u32 2147483648, %v1754_v36  ;;  %vm1759_vm10 = vcmp.eq.f32.partialorder %v1754_v36, 0.0 }
 0xa3a   : > { %v2258_v37 = vpop.eup %2257 }
 0xa3b   : > { %v1756_v38 = vmul.f32 %v2258_v37, %v1754_v36 }
 0xa3d   : > { %v1758_v40 = vsel %vm1757_vm9, %v1754_v36, %v1756_v38 }
 0xa3e   : > { %v1761_v41 = vsel %vm1759_vm10, %v1760_v39, %v1758_v40 }
 0xa3f   : > { %v1769_v42 = vadd.f32 1e-06, %v1761_v41 }
 0xa41   : > { %2259 = vrcp.f32 %v1769_v42 }
 0xa4b   : > { %v2260_v45 = vpop.eup %2259 }
 0xa4c   : > { %v1771_v47 = vmul.f32 %v2260_v45, %v1768_v44 }
 0xa4e   : > { %v1778_v48 = vadd.f32 %v1932_v46, %v1771_v47 }
 0xa50   : > { %1779 = vst.msk [vmem:[%s525_s21] sm:$0xff] %vm535_vm1, %v1778_v48 }
 0xa51   : > { %2360 = shalt.err (!%p2357_p11)
}
 0xa52   : > { %s2361_s14 = scalar_lea.hbm %s2911_s0, 128  ;;  %s2365_s25 = scalar_lea.hbm %s3010_s24, 256 }
 0xa53   : > { %p2362_p0 = scmp.ne.s32.totalorder %s2911_s0, %s2361_s14  ;;  %p2366_p6 = scmp.lt.u32.totalorder %s2911_s0, %s3010_s24 }
 0xa54   : > { %p2367_p7 = scmp.lt.u32.totalorder %s2365_s25, %s2361_s14  ;;  %p2369_p8 = scmp.lt.u32.totalorder %s2361_s14, %s2911_s0 }
 0xa55   : > { %p2363_p4 = pnand %p2362_p0, %p3011_p12 }
 0xa56   : > { %p2368_p2 = por %p2367_p7, %p2366_p6 }
 0xa57   : > { %p2364_p13 = pneg %p2363_p4 }
 0xa58   : > { %p2370_p1 = por %p2369_p8, %p2368_p2 }
 0xa5a   : > { %p2371_p10 = pnand %p2370_p1, %p2364_p13 }
 0xa5c   : > { %2374 = shalt.err (!%p2371_p10)
}
 0xa5d   : > { %2153 = dma.vmem_to_hbm [thread:$0]  (%p3011_p12), %s2913_s27, 128, %s2911_s0, %s1781_s22  }
 0xa5e PF: > { %s3012_s7 = sld [smem:[#allocation15_spill]]  ;;  %s3013_s9 = sld [smem:[#allocation17_spill]] }
 0xa5f   : > { %p3015_p5 = scmp.ge.s32.totalorder %s2433_s18, 2 }
 0xa64   : > { %s1807_s16 = sand.u32 1, %s3012_s7   ;;  %p3014_p3 = scmp.ne.s32.totalorder %s3013_s9, 0 }
 0xa65   : > { %s1808_s12 = scalar_lea.sflag [#allocation7], %s1807_s16 }
 0xa66   : > { %p2167_p9 = pnand %p3015_p5, %p3014_p3 }
 0xa68   : > { %2408 = dma.done.wait (!%p2167_p9), %s1808_s12, 128  }
 0xa69   : > { %2410 = vsyncadd (!%p2167_p9), %s1808_s12, 4294967168  ;;  %s31_s18 = sadd.s32 1, %s2433_s18   ;;  %s3016_s29 = smov %s2417_s30 }
 0xa6a   : > { %p28_p11 = scmp.ge.s32.totalorder %s31_s18, 4   ;;  %s3017_s30 = smov %s2421_s15 }
 0xa6b   : > { %s3018_s15 = smov %s2667_s13  ;;  %s3019_s16 = smov %s2429_s17 }
 0xa6c   : > { %s3020_s17 = smov %s3022_s11  ;;  %30 = sbr.rel (!%p28_p11) target bundleno = 15 (0xf), region = 134 }
 0xa73   :  { %1813 = vsyncpa [#allocation6], 1 }
 0xa74   :  { %1815 = vsyncpa [#allocation6 + $0x1], 1 }
 0xa75   :  { %1816 = vsyncpa [#allocation9], 1 }
 0xa76   :  { %1817 = vsyncpa [#allocation7], 1 }
 0xa77   :  { %1819 = vsyncpa [#allocation7 + $0x1], 1 }

</bundles_post_ra>
